<compile_context>
chip_gen: v5e
topology: v5e:2x2
jax: 0.10.0
libtpu: 0.0.40
codegen_flags: <defaults>
</compile_context>

<pallas_src>
import functools
import math

import jax
import jax.numpy as jnp
from jax.experimental import pallas as pl
from jax.experimental.pallas import tpu as pltpu


def _round_up(n, m):
    return ((n + m - 1) // m) * m


# ---------------------------------------------------------------------------
# One-time probe: does this JAX build accept single-buffered constant inputs
# (pipeline_mode=pl.Buffered(1))?  Probed at import time so the forward path
# carries no try/except and stays fully jittable.
# ---------------------------------------------------------------------------
def _probe_single_buffer_support():
    def _k(c_ref, x_ref, o_ref):
        o_ref[...] = x_ref[...] + c_ref[...]

    try:
        f = pl.pallas_call(
            _k,
            out_shape=jax.ShapeDtypeStruct((16, 128), jnp.float32),
            grid_spec=pltpu.PrefetchScalarGridSpec(
                num_scalar_prefetch=0,
                grid=(2,),
                in_specs=[
                    pl.BlockSpec((8, 128), lambda i: (0, 0),
                                 pipeline_mode=pl.Buffered(1)),
                    pl.BlockSpec((8, 128), lambda i: (i, 0)),
                ],
                out_specs=pl.BlockSpec((8, 128), lambda i: (i, 0)),
            ),
        )
        jax.block_until_ready(
            f(jnp.zeros((8, 128), jnp.float32),
              jnp.zeros((16, 128), jnp.float32)))
        return True
    except Exception:
        return False


_SINGLE_BUFFER_OK = _probe_single_buffer_support()


def mlp_mnist_kernel(x_ref, w1_ref, b1_ref, w2_ref, b2_ref, w3_ref, b3_ref,
                     o_ref):
    # Activations arrive f32 straight from HBM (no wrapper pad/cast pass);
    # cast to bf16 in VMEM so all three matmuls run on the MXU with f32 acc.
    x = x_ref[...].astype(jnp.bfloat16)                       # (tile, 784)
    h1 = jnp.dot(x, w1_ref[...], preferred_element_type=jnp.float32)
    h1 = jnp.maximum(h1 + b1_ref[...], 0.0)
    # dropout (eval mode) -> identity
    h2 = jnp.dot(h1.astype(jnp.bfloat16), w2_ref[...],
                 preferred_element_type=jnp.float32)
    h2 = jnp.maximum(h2 + b2_ref[...], 0.0)
    # dropout (eval mode) -> identity
    # fc3: logits axis lane-padded to 128 -> full-width unmasked stores.
    logits = jnp.dot(h2.astype(jnp.bfloat16), w3_ref[...],
                     preferred_element_type=jnp.float32)
    o_ref[...] = (logits + b3_ref[...]).astype(o_ref.dtype)


def prepare_params(params):
    """One-time weight prep (call once at init, reuse every forward):
    cast matmul operands to bf16 (native MXU dtype) and pad the logits axis
    to 128 lanes.  Biases stay f32 and are added to the f32 accumulators."""
    w1, b1, w2, b2, w3, b3 = params            # (in, out)-layout, f32
    NC = w3.shape[1]
    NC_pad = _round_up(NC, 128)                # 10 -> 128 (lane-dense output)
    w1_p = w1.astype(jnp.bfloat16)
    w2_p = w2.astype(jnp.bfloat16)
    w3_p = jnp.pad(w3, ((0, 0), (0, NC_pad - NC))).astype(jnp.bfloat16)
    b1_p = b1.astype(jnp.float32)
    b2_p = b2.astype(jnp.float32)
    b3_p = jnp.pad(b3, ((0, 0), (0, NC_pad - NC))).astype(jnp.float32)
    return (w1_p, b1_p, w2_p, b2_p, w3_p, b3_p, int(NC))


@functools.partial(
    jax.jit, static_argnames=("batch_tile", "num_classes", "single_buffer"))
def _mlp_forward_jit(x_nchw, w1_p, b1_p, w2_p, b2_p, w3_p, b3_p, *,
                     batch_tile, num_classes, single_buffer):
    B = x_nchw.shape[0]
    D_in = w1_p.shape[0]                       # 784
    NC_pad = w3_p.shape[1]                     # 128

    # nn.Flatten() on NCHW: row-major flatten (no data movement under jit).
    x = x_nchw.reshape(B, D_in).astype(jnp.float32)

    # Batch tile: large (default 1024, multiple of 256) so the per-grid-step
    # overhead is amortised; clamped to a multiple of 16 for tiny batches.
    tile = max(16, _round_up(min(batch_tile, _round_up(B, 16)), 16))
    # Pad only to a multiple of tile (no 2*tile rounding: v5e/v6e are single
    # TensorCore; v7x megacore handles an odd step count fine).
    Bp = _round_up(B, tile)
    if Bp != B:
        x = jnp.pad(x, ((0, Bp - B), (0, 0)))

    grid = (Bp // tile,)

    if single_buffer:
        # Constant index_map => weights fetched once; a second pipeline
        # buffer is pure VMEM waste, so single-buffer them.
        def const_spec(shape):
            return pl.BlockSpec(shape, lambda i: (0, 0),
                                pipeline_mode=pl.Buffered(1))
    else:
        def const_spec(shape):
            return pl.BlockSpec(shape, lambda i: (0, 0))

    out = pl.pallas_call(
        mlp_mnist_kernel,
        out_shape=jax.ShapeDtypeStruct((Bp, NC_pad), jnp.bfloat16),
        grid_spec=pltpu.PrefetchScalarGridSpec(
            num_scalar_prefetch=0,
            grid=grid,
            in_specs=[
                # Activations: tiled over batch, f32 straight from HBM,
                # double-buffered so tile i+1's fetch hides under tile i.
                pl.BlockSpec((tile, D_in), lambda i: (i, 0)),
                const_spec(w1_p.shape),
                const_spec(b1_p.shape),
                const_spec(w2_p.shape),
                const_spec(b2_p.shape),
                const_spec(w3_p.shape),
                const_spec(b3_p.shape),
            ],
            out_specs=pl.BlockSpec((tile, NC_pad), lambda i: (i, 0)),
        ),
        compiler_params=pltpu.CompilerParams(
            dimension_semantics=("parallel",),
            # ~16 MiB live at tile=1024: 32 MiB lifts v5e's 16 MiB scoped
            # default and stays well inside v7x's 64 MiB physical VMEM.
            # (tile=2048 on v6e/v7x would need this raised.)
            vmem_limit_bytes=32 * 1024 * 1024,
        ),
    )(x, w1_p, b1_p, w2_p, b2_p, w3_p, b3_p)

    # Drop batch/class padding; up-cast bf16 logits to f32 for the caller.
    return out[:B, :num_classes].astype(jnp.float32)


def mlp_mnist_forward(x_nchw, params, *, batch_tile=1024):
    """x_nchw: (B, 1, 28, 28).  `params` is either the raw f32 parameter
    tuple or (preferred) the output of prepare_params() so weights are cast
    and padded exactly once.  Returns (B, num_classes) float32 logits."""
    prepared = params if len(params) == 7 else prepare_params(params)
    w1_p, b1_p, w2_p, b2_p, w3_p, b3_p, num_classes = prepared
    return _mlp_forward_jit(
        x_nchw, w1_p, b1_p, w2_p, b2_p, w3_p, b3_p,
        batch_tile=int(batch_tile), num_classes=int(num_classes),
        single_buffer=_SINGLE_BUFFER_OK)


def init_params(key, num_classes):
    """Deterministic init matching nn.Linear's U(-1/sqrt(fan_in), +1/sqrt(fan_in)).
    Weights are stored as (in_features, out_features)."""
    dims = [(28 * 28, 512), (512, 256), (256, num_classes)]
    params = []
    for (fan_in, fan_out) in dims:
        key, kw, kb = jax.random.split(key, 3)
        bound = 1.0 / math.sqrt(fan_in)
        w = jax.random.uniform(kw, (fan_in, fan_out), jnp.float32,
                               minval=-bound, maxval=bound)
        b = jax.random.uniform(kb, (1, fan_out), jnp.float32,
                               minval=-bound, maxval=bound)
        params.extend([w, b])
    return tuple(params)


def reference_forward(x_nchw, params):
    """Pure-JAX reference applying the same bf16 matmul-operand quantization
    (accumulation and output kept in f32)."""
    w1, b1, w2, b2, w3, b3 = params
    bf = lambda a: a.astype(jnp.bfloat16).astype(jnp.float32)
    x = bf(x_nchw.reshape(x_nchw.shape[0], -1).astype(jnp.float32))
    h1 = jnp.maximum(x @ bf(w1) + b1, 0.0)
    h2 = jnp.maximum(bf(h1) @ bf(w2) + b2, 0.0)
    return bf(h2) @ bf(w3) + b3


if __name__ == "__main__":
    key = jax.random.PRNGKey(0)
    k_params, k_x = jax.random.split(key)

    num_classes = 10
    batch = 2
    params = init_params(k_params, num_classes)
    prepared = prepare_params(params)        # one-time weight cast/pad
    x = jax.random.normal(k_x, (batch, 1, 28, 28), jnp.float32)

    out = jax.block_until_ready(mlp_mnist_forward(x, prepared))
    ref = reference_forward(x, params)

    assert out.shape == (batch, num_classes)
    # Tolerance covers bf16 matmul operands + bf16 logits writeback.
    assert jnp.allclose(out, ref, atol=3e-2, rtol=3e-2), "mismatch vs reference"

    print("KERNEL_OK")
</pallas_src>

<mosaic_0001>
module attributes {stable_mosaic.version = 11 : i64} {
  func.func @_k(%arg0: i32, %arg1: memref<8x128xf32, #tpu.memory_space<vmem>>, %arg2: memref<8x128xf32, #tpu.memory_space<vmem>>, %arg3: memref<8x128xf32, #tpu.memory_space<vmem>>) attributes {dimension_semantics = [#tpu.dimension_semantics<arbitrary>], iteration_bounds = array<i64: 2>, scalar_prefetch = 0 : i64, scratch_operands = 0 : i64, tpu.core_type = #tpu.core_type<tc>, window_params = [{pipeline_mode = #tpu.pipeline_mode<synchronous>, transform_indices = @transform_0, window_bounds = array<i64: 8, 128>}, {transform_indices = @transform_1, window_bounds = array<i64: 8, 128>}, {transform_indices = @transform_2, window_bounds = array<i64: 8, 128>}]} {
    %c0 = arith.constant 0 : index
    %c0_0 = arith.constant 0 : index
    %0 = vector.load %arg2[%c0, %c0_0] : memref<8x128xf32, #tpu.memory_space<vmem>>, vector<8x128xf32>
    %c0_1 = arith.constant 0 : index
    %c0_2 = arith.constant 0 : index
    %1 = vector.load %arg1[%c0_1, %c0_2] : memref<8x128xf32, #tpu.memory_space<vmem>>, vector<8x128xf32>
    %2 = arith.addf %0, %1 : vector<8x128xf32>
    %c0_3 = arith.constant 0 : index
    %c0_4 = arith.constant 0 : index
    %3 = vector.load %arg3[%c0_3, %c0_4] : memref<8x128xf32, #tpu.memory_space<vmem>>, vector<8x128xf32>
    tpu.vector_store %arg3[%c0_3, %c0_4], %2 {strides = array<i32>} : memref<8x128xf32, #tpu.memory_space<vmem>>, vector<8x128xf32>,
    return
  }
  func.func @transform_0(%arg0: i32) -> (i32, i32) {
    %c0_i32 = arith.constant 0 : i32
    %c0_i32_0 = arith.constant 0 : i32
    %c0_i32_1 = arith.constant 0 : i32
    return %c0_i32, %c0_i32_0 : i32, i32
  }
  func.func @transform_1(%arg0: i32) -> (i32, i32) {
    %c0_i32 = arith.constant 0 : i32
    %c0_i32_0 = arith.constant 0 : i32
    return %arg0, %c0_i32 : i32, i32
  }
  func.func @transform_2(%arg0: i32) -> (i32, i32) {
    %c0_i32 = arith.constant 0 : i32
    %c0_i32_0 = arith.constant 0 : i32
    return %arg0, %c0_i32 : i32, i32
  }
}

module attributes {stable_mosaic.version = 11 : i64} {
  func.func @mlp_mnist_kernel(%arg0: i32, %arg1: memref<16x784xf32, #tpu.memory_space<vmem>>, %arg2: memref<784x512xbf16, #tpu.memory_space<vmem>>, %arg3: memref<1x512xf32, #tpu.memory_space<vmem>>, %arg4: memref<512x256xbf16, #tpu.memory_space<vmem>>, %arg5: memref<1x256xf32, #tpu.memory_space<vmem>>, %arg6: memref<256x128xbf16, #tpu.memory_space<vmem>>, %arg7: memref<1x128xf32, #tpu.memory_space<vmem>>, %arg8: memref<16x128xbf16, #tpu.memory_space<vmem>>) attributes {dimension_semantics = [#tpu.dimension_semantics<parallel>], iteration_bounds = array<i64: 1>, scalar_prefetch = 0 : i64, scratch_operands = 0 : i64, tpu.core_type = #tpu.core_type<tc>, window_params = [{transform_indices = @transform_0, window_bounds = array<i64: 16, 784>}, {pipeline_mode = #tpu.pipeline_mode<synchronous>, transform_indices = @transform_1, window_bounds = array<i64: 784, 512>}, {pipeline_mode = #tpu.pipeline_mode<synchronous>, transform_indices = @transform_2, window_bounds = array<i64: 1, 512>}, {pipeline_mode = #tpu.pipeline_mode<synchronous>, transform_indices = @transform_3, window_bounds = array<i64: 512, 256>}, {pipeline_mode = #tpu.pipeline_mode<synchronous>, transform_indices = @transform_4, window_bounds = array<i64: 1, 256>}, {pipeline_mode = #tpu.pipeline_mode<synchronous>, transform_indices = @transform_5, window_bounds = array<i64: 256, 128>}, {pipeline_mode = #tpu.pipeline_mode<synchronous>, transform_indices = @transform_6, window_bounds = array<i64: 1, 128>}, {transform_indices = @transform_7, window_bounds = array<i64: 16, 128>}]} {
    %c0 = arith.constant 0 : index
    %c0_0 = arith.constant 0 : index
    %0 = vector.load %arg1[%c0, %c0_0] : memref<16x784xf32, #tpu.memory_space<vmem>>, vector<16x784xf32>
    %1 = arith.truncf %0 : vector<16x784xf32> to vector<16x784xbf16>
    %c0_1 = arith.constant 0 : index
    %c0_2 = arith.constant 0 : index
    %2 = vector.load %arg2[%c0_1, %c0_2] : memref<784x512xbf16, #tpu.memory_space<vmem>>, vector<784x512xbf16>
    %cst = arith.constant dense<0.000000e+00> : vector<16x512xf32>
    %3 = tpu.matmul %1, %2, %cst {dimension_numbers = #tpu.dot_dimension_numbers<[1], [0], [0], [1], [0, 0, 1, 1], [], []>} : vector<16x784xbf16>, vector<784x512xbf16>, vector<16x512xf32> -> vector<16x512xf32>
    %c0_3 = arith.constant 0 : index
    %c0_4 = arith.constant 0 : index
    %4 = vector.load %arg3[%c0_3, %c0_4] : memref<1x512xf32, #tpu.memory_space<vmem>>, vector<1x512xf32>
    %5 = vector.broadcast %4 : vector<1x512xf32> to vector<16x512xf32>
    %6 = arith.addf %3, %5 : vector<16x512xf32>
    %cst_5 = arith.constant 0.000000e+00 : f32
    %7 = vector.broadcast %cst_5 : f32 to vector<16x512xf32>
    %8 = arith.maximumf %6, %7 : vector<16x512xf32>
    %9 = arith.truncf %8 : vector<16x512xf32> to vector<16x512xbf16>
    %c0_6 = arith.constant 0 : index
    %c0_7 = arith.constant 0 : index
    %10 = vector.load %arg4[%c0_6, %c0_7] : memref<512x256xbf16, #tpu.memory_space<vmem>>, vector<512x256xbf16>
    %cst_8 = arith.constant dense<0.000000e+00> : vector<16x256xf32>
    %11 = tpu.matmul %9, %10, %cst_8 {dimension_numbers = #tpu.dot_dimension_numbers<[1], [0], [0], [1], [0, 0, 1, 1], [], []>} : vector<16x512xbf16>, vector<512x256xbf16>, vector<16x256xf32> -> vector<16x256xf32>
    %c0_9 = arith.constant 0 : index
    %c0_10 = arith.constant 0 : index
    %12 = vector.load %arg5[%c0_9, %c0_10] : memref<1x256xf32, #tpu.memory_space<vmem>>, vector<1x256xf32>
    %13 = vector.broadcast %12 : vector<1x256xf32> to vector<16x256xf32>
    %14 = arith.addf %11, %13 : vector<16x256xf32>
    %cst_11 = arith.constant 0.000000e+00 : f32
    %15 = vector.broadcast %cst_11 : f32 to vector<16x256xf32>
    %16 = arith.maximumf %14, %15 : vector<16x256xf32>
    %17 = arith.truncf %16 : vector<16x256xf32> to vector<16x256xbf16>
    %c0_12 = arith.constant 0 : index
    %c0_13 = arith.constant 0 : index
    %18 = vector.load %arg6[%c0_12, %c0_13] : memref<256x128xbf16, #tpu.memory_space<vmem>>, vector<256x128xbf16>
    %cst_14 = arith.constant dense<0.000000e+00> : vector<16x128xf32>
    %19 = tpu.matmul %17, %18, %cst_14 {dimension_numbers = #tpu.dot_dimension_numbers<[1], [0], [0], [1], [0, 0, 1, 1], [], []>} : vector<16x256xbf16>, vector<256x128xbf16>, vector<16x128xf32> -> vector<16x128xf32>
    %c0_15 = arith.constant 0 : index
    %c0_16 = arith.constant 0 : index
    %20 = vector.load %arg7[%c0_15, %c0_16] : memref<1x128xf32, #tpu.memory_space<vmem>>, vector<1x128xf32>
    %21 = vector.broadcast %20 : vector<1x128xf32> to vector<16x128xf32>
    %22 = arith.addf %19, %21 : vector<16x128xf32>
    %23 = arith.truncf %22 : vector<16x128xf32> to vector<16x128xbf16>
    %c0_17 = arith.constant 0 : index
    %c0_18 = arith.constant 0 : index
    %24 = vector.load %arg8[%c0_17, %c0_18] : memref<16x128xbf16, #tpu.memory_space<vmem>>, vector<16x128xbf16>
    tpu.vector_store %arg8[%c0_17, %c0_18], %23 {strides = array<i32>} : memref<16x128xbf16, #tpu.memory_space<vmem>>, vector<16x128xbf16>,
    return
  }
  func.func @transform_0(%arg0: i32) -> (i32, i32) {
    %c0_i32 = arith.constant 0 : i32
    %c0_i32_0 = arith.constant 0 : i32
    return %arg0, %c0_i32 : i32, i32
  }
  func.func @transform_1(%arg0: i32) -> (i32, i32) {
    %c0_i32 = arith.constant 0 : i32
    %c0_i32_0 = arith.constant 0 : i32
    %c0_i32_1 = arith.constant 0 : i32
    return %c0_i32, %c0_i32_0 : i32, i32
  }
  func.func @transform_2(%arg0: i32) -> (i32, i32) {
    %c0_i32 = arith.constant 0 : i32
    %c0_i32_0 = arith.constant 0 : i32
    %c0_i32_1 = arith.constant 0 : i32
    return %c0_i32, %c0_i32_0 : i32, i32
  }
  func.func @transform_3(%arg0: i32) -> (i32, i32) {
    %c0_i32 = arith.constant 0 : i32
    %c0_i32_0 = arith.constant 0 : i32
    %c0_i32_1 = arith.constant 0 : i32
    return %c0_i32, %c0_i32_0 : i32, i32
  }
  func.func @transform_4(%arg0: i32) -> (i32, i32) {
    %c0_i32 = arith.constant 0 : i32
    %c0_i32_0 = arith.constant 0 : i32
    %c0_i32_1 = arith.constant 0 : i32
    return %c0_i32, %c0_i32_0 : i32, i32
  }
  func.func @transform_5(%arg0: i32) -> (i32, i32) {
    %c0_i32 = arith.constant 0 : i32
    %c0_i32_0 = arith.constant 0 : i32
    %c0_i32_1 = arith.constant 0 : i32
    return %c0_i32, %c0_i32_0 : i32, i32
  }
  func.func @transform_6(%arg0: i32) -> (i32, i32) {
    %c0_i32 = arith.constant 0 : i32
    %c0_i32_0 = arith.constant 0 : i32
    %c0_i32_1 = arith.constant 0 : i32
    return %c0_i32, %c0_i32_0 : i32, i32
  }
  func.func @transform_7(%arg0: i32) -> (i32, i32) {
    %c0_i32 = arith.constant 0 : i32
    %c0_i32_0 = arith.constant 0 : i32
    return %arg0, %c0_i32 : i32, i32
  }
}

</mosaic_0001>

<bundles_post_ra>
// kernel: tpu_custom_call.1
= control target key start
LH: loop header
LB: loop body
LE: loop exit
PB: predicated region body
PF: predicated region fallthrough
CT: control target
= control target key end

     0   :  { %7 = vsyncpa [#allocation3], 0  ;;  %s635_s0 = inlined_call_operand.hbm [shape: f32[8,128], index: 0, kind: input, shape index: {}]   ;;  %s636_s1 = inlined_call_operand.hbm [shape: f32[16,128], index: 1, kind: input, shape index: {}]   ;;  %s637_s2 = inlined_call_operand.hbm [shape: f32[16,128], index: 2, kind: output, shape index: {}]  }
   0x1   :  { %8 = vsyncpa [#allocation6], 0 }
   0x2   :  { %10 = vsyncpa [#allocation6 + $0x1], 0 }
   0x3   :  { %11 = vsyncpa [#allocation4], 0 }
   0x4   :  { %13 = vsyncpa [#allocation4 + $0x1], 0  ;;  %s497_s9 = smov 0   ;;  %s499_s10 = smov 0  }
   0x5   :  { %s501_s11 = smov 0   ;;  %s503_s12 = smov 0  }
   0x6 LB: > { %s518_s13 = sadd.s32 4294967295, %s479_s12   ;;  %s278_s14 = sadd.s32 4294967294, %s479_s12   ;;  %s479_s12 = sphi %s503_s12, %s647_s12   ;;  %s475_s11 = sphi %s501_s11, %s646_s11   ;;  %s471_s10 = sphi %s499_s10, %s645_s10   ;;  %s467_s9 = sphi %s497_s9, %s644_s9  }
   0x7   : > { %p60_p0 = scmp.ne.s32.totalorder %s471_s10, %s467_s9  ;;  %p61_p1 = scmp.eq.s32.totalorder %s518_s13, 0 }
   0x8   : > { %p84_p2 = scmp.eq.s32.totalorder %s518_s13, 1  ;;  %p90_p3 = scmp.eq.s32.totalorder %s278_s14, 1 }
   0x9   : > { %p527_p4 = por %p61_p1, %p60_p0  ;;  %p279_p5 = scmp.ge.s32.totalorder %s479_s12, 1 }
   0xa   : > { %p532_p6 = por %p90_p3, %p60_p0  ;;  %p97_p7 = scmp.lt.s32.totalorder %s479_s12, 3 }
   0xb   : > { %s109_s19 = sshll.u32 %s635_s0, 4  ;;  %s481_s21 = smov [#allocation2]   ;;  %s110_s19 = int_to_ptr.hbm [resolvable:$true] %s109_s19 }
   0xc   : > { %p540_p8 = pnand %p279_p5, %p97_p7  ;;  %s111_s22 = sshll.u32 %s481_s21, 4  ;;  %s112_s22 = int_to_ptr.vmem [resolvable:$true] %s111_s22 }
   0xd   : > { %s550_s23 = sadd.s32 1, %s479_s12   ;;  %s47_s24 = sadd.s32 1, %s475_s11 }
   0xe   : > { %p300_p10 = pneg %p540_p8  ;;  %s44_s25 = ssub.s32 %s479_s12, %s550_s23 }
   0xf   : > { %p45_p12 = scmp.eq.s32.totalorder %s44_s25, 0  ;;  %p54_p13 = scmp.ne.s32.totalorder %s475_s11, %s471_s10 }
  0x10   : > { %p301_p11 = pnand %p300_p10, %p61_p1  ;;  %p55_p0 = scmp.eq.s32.totalorder %s479_s12, 0 }
  0x11   : > { %s559_s26 = scalar_select %p45_p12, %s475_s11, %s47_s24  }
  0x12   : > { %303 = dma.hbm_to_vmem [thread:$0]  (!%p301_p11), %s110_s19, 128, %s112_s22, [#allocation3]  }
  0x13   : > { %p563_p3 = por %p84_p2, %p54_p13  ;;  %p313_p5 = scmp.lt.s32.totalorder %s479_s12, 2 }
  0x14   : > { %s122_s28 = sand.u32 1, %s475_s11   ;;  %s283_s29 = sshll.u32 %s479_s12, 3 }
  0x15   : > { %p56_p7 = por %p55_p0, %p54_p13  ;;  %s282_s30 = sshll.u32 %s122_s28, 3 }
  0x16   : > { %s130_s5 = scalar_lea.hbm %s636_s1, %s283_s29  ;;  %s126_s7 = scalar_lea.vmem [#allocation5], %s282_s30 }
  0x17   : > { %s132_s6 = sshll.u32 %s130_s5, 4  ;;  %s134_s8 = sshll.u32 %s126_s7, 4  ;;  %s133_s6 = int_to_ptr.hbm [resolvable:$true] %s132_s6  ;;  %s135_s8 = int_to_ptr.vmem [resolvable:$true] %s134_s8 }
  0x18   : > { %p573_p10 = pnand %p313_p5, %p56_p7  ;;  %s123_s17 = scalar_lea.sflag [#allocation6], %s122_s28 }
  0x19   : > { %s379_s18 = sshra.s32 %s133_s6, 4  ;;  %s386_s24 = scalar_lea.hbm %s636_s1, 16  ;;  %s380_s18 = int_to_ptr.hbm [resolvable:$true] %s379_s18 }
  0x1a   : > { %s381_s19 = scalar_lea.hbm %s380_s18, 8  ;;  %p383_p11 = pneg %p573_p10 }
  0x1b   : > { %p382_p2 = scmp.ne.s32.totalorder %s380_s18, %s381_s19  ;;  %p387_p0 = scmp.lt.s32.totalorder %s380_s18, %s636_s1 }
  0x1c   : > { %p388_p5 = scmp.lt.s32.totalorder %s386_s24, %s381_s19 }
  0x1d   : > { %p384_p12 = pnand %p383_p11, %p382_p2 }
  0x1e   : > { %p389_p7 = por %p388_p5, %p387_p0 }
  0x1f   : > { %p385_p13 = pneg %p384_p12 }
  0x21   : > { %p390_p9 = pnand %p389_p7, %p385_p13 }
  0x23   : > { %393 = shalt.err (!%p390_p9)
}
  0x24   : > { %307 = dma.hbm_to_vmem [thread:$0]  (!%p573_p10), %s133_s6, 128, %s135_s8, %s123_s17  }
  0x25   : > { %143 = sbr.rel (%p540_p8) target bundleno = 62 (0x3e), region = 28 }
  0x2a   : > { %454 = dma.done.wait (%p61_p1), [#allocation3], 128  }
  0x2b   : > { %456 = vsyncadd (%p61_p1), [#allocation3], 4294967168  ;;  %s594_s28 = sand.u32 1, %s471_s10  }
  0x2c   : > { %s286_s30 = sshll.u32 %s594_s28, 3  ;;  %s151_s3 = scalar_lea.sflag [#allocation6], %s594_s28 }
  0x2d   : > { %s154_s4 = scalar_lea.vmem [#allocation5], %s286_s30 }
  0x2e   : > { %458 = dma.done.wait (%p527_p4), %s151_s3, 128  }
  0x2f   : > { %460 = vsyncadd (%p527_p4), %s151_s3, 4294967168  ;;  %s289_s20 = sshll.u32 %s518_s13, 3  ;;  %s175_s8 = scalar_lea.vmem [#allocation7], %s286_s30  ;;  %v176_v0 = vld [vmem:[%s154_s4] sm:$0xff]  ;;  %v177_v1 = vld [vmem:[#allocation2] sm:$0xff] }
  0x30   : > { %s191_s7 = scalar_lea.hbm %s637_s2, %s289_s20  ;;  %s193_s14 = sshll.u32 %s175_s8, 4  ;;  %v178_v2 = vadd.f32 %v177_v1, %v176_v0  ;;  %s194_s14 = int_to_ptr.vmem [resolvable:$true] %s193_s14 }
  0x31   : > { %s195_s17 = sshll.u32 %s191_s7, 4  ;;  %s181_s18 = scalar_lea.sflag [#allocation4], %s594_s28  ;;  %s196_s17 = int_to_ptr.hbm [resolvable:$true] %s195_s17 }
  0x32   : > { %179 = vst [vmem:[%s175_s8] sm:$0xff] %v178_v2  ;;  %s423_s15 = sshra.s32 %s196_s17, 4  ;;  %s429_s22 = scalar_lea.hbm %s637_s2, 16  ;;  %s424_s15 = int_to_ptr.hbm [resolvable:$true] %s423_s15 }
  0x33   : > { %s425_s19 = scalar_lea.hbm %s424_s15, 8  ;;  %p430_p9 = scmp.lt.s32.totalorder %s424_s15, %s637_s2 }
  0x34   : > { %p426_p1 = scmp.ne.s32.totalorder %s424_s15, %s425_s19  ;;  %p431_p10 = scmp.lt.s32.totalorder %s429_s22, %s425_s19 }
  0x36   : > { %p427_p4 = pnand %p426_p1, %p563_p3  ;;  %p432_p2 = por %p431_p10, %p430_p9 }
  0x38   : > { %p428_p8 = pneg %p427_p4 }
  0x3a   : > { %p433_p11 = pnand %p432_p2, %p428_p8 }
  0x3c   : > { %436 = shalt.err (!%p433_p11)
}
  0x3d   : > { %298 = dma.vmem_to_hbm [thread:$0]  (%p563_p3), %s194_s14, 128, %s196_s17, %s181_s18  }
  0x3e PF: > { %s207_s29 = sand.u32 1, %s467_s9   ;;  %p643_p12 = scmp.ge.s32.totalorder %s479_s12, 2 }
  0x3f   : > { %s208_s28 = scalar_lea.sflag [#allocation4], %s207_s29 }
  0x40   : > { %p309_p13 = pnand %p643_p12, %p532_p6 }
  0x42   : > { %p310_p0 = pneg %p309_p13 }
  0x44   : > { %462 = dma.done.wait (%p310_p0), %s208_s28, 128  }
  0x45   : > { %464 = vsyncadd (%p310_p0), %s208_s28, 4294967168  ;;  %p16_p5 = scmp.ge.s32.totalorder %s550_s23, 4   ;;  %s644_s9 = smov %s471_s10 }
  0x46   : > { %s645_s10 = smov %s475_s11  ;;  %s646_s11 = smov %s559_s26 }
  0x47   : > { %s647_s12 = smov %s550_s23  ;;  %18 = sbr.rel (!%p16_p5) target bundleno = 6 (0x6), region = 78 }
  0x4c   :  { %214 = vsyncpa [#allocation3], 1 }
  0x4d   :  { %216 = vsyncpa [#allocation3 + $0x1], 1 }
  0x4e   :  { %217 = vsyncpa [#allocation6], 1 }
  0x4f   :  { %219 = vsyncpa [#allocation6 + $0x1], 1 }
  0x50   :  { %220 = vsyncpa [#allocation4], 1 }
  0x51   :  { %222 = vsyncpa [#allocation4 + $0x1], 1 }

// kernel: _mlp_forward_jit.1
= control target key start
LH: loop header
LB: loop body
LE: loop exit
PB: predicated region body
PF: predicated region fallthrough
CT: control target
= control target key end

     0   :  { %12 = vsyncpa [#allocation3], 0  ;;  %s4013_s0 = inlined_call_operand.vmem [shape: f32[16,784], index: 0, kind: input, shape index: {}]   ;;  %s4014_s1 = inlined_call_operand.hbm [shape: bf16[784,512], index: 1, kind: input, shape index: {}]   ;;  %s4015_s2 = inlined_call_operand.vmem [shape: f32[1,512], index: 2, kind: input, shape index: {}]   ;;  %s4016_s3 = inlined_call_operand.hbm [shape: bf16[512,256], index: 3, kind: input, shape index: {}]   ;;  %s4017_s4 = inlined_call_operand.vmem [shape: f32[1,256], index: 4, kind: input, shape index: {}]   ;;  %s4018_s5 = inlined_call_operand.vmem [shape: bf16[256,128], index: 5, kind: input, shape index: {}]   ;;  %s4019_s6 = inlined_call_operand.vmem [shape: f32[1,128], index: 6, kind: input, shape index: {}]   ;;  %s4020_s7 = inlined_call_operand.vmem [shape: bf16[16,128], index: 7, kind: output, shape index: {}]  }
   0x1   :  { %s20_s26 = sshll.u32 %s4014_s1, 4  ;;  %s21_s26 = int_to_ptr.hbm [resolvable:$true] %s20_s26 }
   0x2   :  { %13 = vsyncpa [#allocation5], 0  ;;  %s3800_s27 = smov [#allocation2]   ;;  %s35_s8 = sshll.u32 %s4016_s3, 4  ;;  %s36_s8 = int_to_ptr.hbm [resolvable:$true] %s35_s8 }
   0x3   :  { %s22_s28 = sshll.u32 %s3800_s27, 4  ;;  %s3801_s9 = smov 256   ;;  %s23_s28 = int_to_ptr.vmem [resolvable:$true] %s22_s28 }
   0x4   :  { %s3802_s10 = smov 16   ;;  %s3803_s11 = smov [#allocation4]  }
   0x5   :  { %28 = dma.hbm_to_vmem [thread:$0]  %s21_s26, 25088, %s23_s28, [#allocation3], %s3801_s9, %s3801_s9, %s3802_s10  }
   0x6   :  { %s37_s12 = sshll.u32 %s3803_s11, 4  ;;  %s3804_s13 = smov 128   ;;  %s38_s12 = int_to_ptr.vmem [resolvable:$true] %s37_s12 }
   0x7   :  { %s3805_s14 = smov 8  }
   0x8   :  { %43 = dma.hbm_to_vmem [thread:$0]  %s36_s8, 8192, %s38_s12, [#allocation5], %s3804_s13, %s3804_s13, %s3805_s14  }
   0x9   :  { %3796 = dma.done.wait [#allocation3], 25088  }
   0xa   :  { %3797 = vsyncadd [#allocation3], 4294942208 }
   0xb   :  { %3798 = dma.done.wait [#allocation5], 8192  }
   0xc   :  { %3799 = vsyncadd [#allocation5], 4294959104  ;;  %v2466_v0 = vld [vmem:[#allocation2 + $0xe0] sm:$0xf]  ;;  %v3490_v1 = vld [vmem:[#allocation2 + $0xec] sm:$0xf0] }
   0xd   :  { %v2594_v2 = vld [vmem:[#allocation2 + $0x1e0] sm:$0xf]  ;;  %v2467_v3 = vor.u32 %v3490_v1, %v2466_v0  ;;  %v3522_v4 = vld [vmem:[#allocation2 + $0x1ec] sm:$0xf0]  ;;  %vm1266_vm0 = vcmask 130048  }
   0xe   :  { %v2722_v5 = vld [vmem:[#allocation2 + $0x2e0] sm:$0xf]  ;;  %v3554_v6 = vld [vmem:[#allocation2 + $0x2ec] sm:$0xf0]  ;;  %v2595_v7 = vor.u32 %v3522_v4, %v2594_v2 }
   0xf   :  { %v2723_v8 = vor.u32 %v3554_v6, %v2722_v5  ;;  %v2850_v9 = vld [vmem:[#allocation2 + $0x3e0] sm:$0xf]  ;;  %v3586_v10 = vld [vmem:[#allocation2 + $0x3ec] sm:$0xf0]  ;;  %1270 = vmatpush.bf16.msra.mxu0 %v2467_v3 }
  0x10   :  { %v2450_v11 = vld [vmem:[#allocation2 + $0xc0] sm:$0xf]  ;;  %v2851_v12 = vor.u32 %v3586_v10, %v2850_v9  ;;  %v3486_v13 = vld [vmem:[#allocation2 + $0xcc] sm:$0xf0]  ;;  %1284 = vmatpush.bf16.msra.mxu1 %v2595_v7 }
  0x11   :  { %v2578_v14 = vld [vmem:[#allocation2 + $0x1c0] sm:$0xf]  ;;  %v3518_v15 = vld [vmem:[#allocation2 + $0x1cc] sm:$0xf0]  ;;  %1298 = vmatpush.bf16.msra.mxu2 %v2723_v8  ;;  %v2451_v16 = vor.u32 %v3486_v13, %v2450_v11 }
  0x12   :  { %v2579_v17 = vor.u32 %v3518_v15, %v2578_v14  ;;  %v2706_v18 = vld [vmem:[#allocation2 + $0x2c0] sm:$0xf]  ;;  %v3550_v19 = vld [vmem:[#allocation2 + $0x2cc] sm:$0xf0]  ;;  %1312 = vmatpush.bf16.msra.mxu3 %v2851_v12 }
  0x13   :  { %v2834_v20 = vld [vmem:[#allocation2 + $0x3c0] sm:$0xf]  ;;  %v2707_v21 = vor.u32 %v3550_v19, %v2706_v18  ;;  %v3582_v22 = vld [vmem:[#allocation2 + $0x3cc] sm:$0xf0]  ;;  %1271 = vmatpush.bf16.msra.mxu0 %v2451_v16 }
  0x14   :  { %v2434_v23 = vld [vmem:[#allocation2 + $0xa0] sm:$0xf]  ;;  %v3482_v24 = vld [vmem:[#allocation2 + $0xac] sm:$0xf0]  ;;  %v2835_v25 = vor.u32 %v3582_v22, %v2834_v20  ;;  %1285 = vmatpush.bf16.msra.mxu1 %v2579_v17 }
  0x15   :  { %v2562_v26 = vld [vmem:[#allocation2 + $0x1a0] sm:$0xf]  ;;  %v3514_v27 = vld [vmem:[#allocation2 + $0x1ac] sm:$0xf0]  ;;  %v2435_v29 = vor.u32 %v3482_v24, %v2434_v23  ;;  %1299 = vmatpush.bf16.msra.mxu2 %v2707_v21 }
  0x16   :  { %v2690_v28 = vld [vmem:[#allocation2 + $0x2a0] sm:$0xf]  ;;  %v3546_v30 = vld [vmem:[#allocation2 + $0x2ac] sm:$0xf0]  ;;  %v2563_v33 = vor.u32 %v3514_v27, %v2562_v26  ;;  %1313 = vmatpush.bf16.msra.mxu3 %v2835_v25 }
  0x17   :  { %v2818_v31 = vld [vmem:[#allocation2 + $0x3a0] sm:$0xf]  ;;  %v3578_v32 = vld [vmem:[#allocation2 + $0x3ac] sm:$0xf0]  ;;  %v2691_v34 = vor.u32 %v3546_v30, %v2690_v28  ;;  %1272 = vmatpush.bf16.msra.mxu0 %v2435_v29 }
  0x18   :  { %v2418_v35 = vld [vmem:[#allocation2 + $0x80] sm:$0xf]  ;;  %v3478_v36 = vld [vmem:[#allocation2 + $0x8c] sm:$0xf0]  ;;  %v2819_v38 = vor.u32 %v3578_v32, %v2818_v31  ;;  %1286 = vmatpush.bf16.msra.mxu1 %v2563_v33  ;;  %v3488_v32 = vld [vmem:[#allocation2 + $0xe4] sm:$0xf] }
  0x19   :  { %v2546_v37 = vld [vmem:[#allocation2 + $0x180] sm:$0xf]  ;;  %v3510_v39 = vld [vmem:[#allocation2 + $0x18c] sm:$0xf0]  ;;  %v2419_v44 = vor.u32 %v3478_v36, %v2418_v35  ;;  %1300 = vmatpush.bf16.msra.mxu2 %v2691_v34  ;;  %v2468_v33 = vld [vmem:[#allocation2 + $0xf0] sm:$0xf0] }
  0x1a   :  { %v2674_v40 = vld [vmem:[#allocation2 + $0x280] sm:$0xf]  ;;  %v3542_v41 = vld [vmem:[#allocation2 + $0x28c] sm:$0xf0]  ;;  %v2547_v45 = vor.u32 %v3510_v39, %v2546_v37  ;;  %1314 = vmatpush.bf16.msra.mxu3 %v2819_v38  ;;  %v68_v36 = vld [vmem:[%s4013_s0 + $0x48] sm:$0xff] }
  0x1b   :  { %v2802_v42 = vld [vmem:[#allocation2 + $0x380] sm:$0xf]  ;;  %v3574_v43 = vld [vmem:[#allocation2 + $0x38c] sm:$0xf0]  ;;  %v2675_v46 = vor.u32 %v3542_v41, %v2674_v40  ;;  %1273 = vmatpush.bf16.msra.mxu0 %v2419_v44  ;;  %v3520_v41 = vld [vmem:[#allocation2 + $0x1e4] sm:$0xf] }
  0x1c   :  { %v2402_v47 = vld [vmem:[#allocation2 + $0x60] sm:$0xf]  ;;  %v3474_v48 = vld [vmem:[#allocation2 + $0x6c] sm:$0xf0]  ;;  %v2803_v50 = vor.u32 %v3574_v43, %v2802_v42  ;;  %1287 = vmatpush.bf16.msra.mxu1 %v2547_v45  ;;  %v66_v43 = vld [vmem:[%s4013_s0 + $0x38] sm:$0xff] }
  0x1d   :  { %v2530_v49 = vld [vmem:[#allocation2 + $0x160] sm:$0xf]  ;;  %v3506_v51 = vld [vmem:[#allocation2 + $0x16c] sm:$0xf0]  ;;  %v2403_v56 = vor.u32 %v3474_v48, %v2402_v47  ;;  %1301 = vmatpush.bf16.msra.mxu2 %v2675_v46  ;;  %v2596_v46 = vld [vmem:[#allocation2 + $0x1f0] sm:$0xf0] }
  0x1e   :  { %v2658_v52 = vld [vmem:[#allocation2 + $0x260] sm:$0xf]  ;;  %v3538_v53 = vld [vmem:[#allocation2 + $0x26c] sm:$0xf0]  ;;  %v2531_v57 = vor.u32 %v3506_v51, %v2530_v49  ;;  %1315 = vmatpush.bf16.msra.mxu3 %v2803_v50  ;;  %v62_v47 = vld [vmem:[%s4013_s0 + $0x18] sm:$0xff]  ;;  %v2471_v50 = vor.u32 %v3488_v32, %v2468_v33 }
  0x1f   :  { %v2786_v54 = vld [vmem:[#allocation2 + $0x360] sm:$0xf]  ;;  %v3570_v55 = vld [vmem:[#allocation2 + $0x36c] sm:$0xf0]  ;;  %v2659_v58 = vor.u32 %v3538_v53, %v2658_v52  ;;  %1274 = vmatpush.bf16.msra.mxu0 %v2403_v56 }
  0x20   :  { %v2386_v59 = vld [vmem:[#allocation2 + $0x40] sm:$0xf]  ;;  %v3470_v60 = vld [vmem:[#allocation2 + $0x4c] sm:$0xf0]  ;;  %v2787_v62 = vor.u32 %v3570_v55, %v2786_v54  ;;  %1288 = vmatpush.bf16.msra.mxu1 %v2531_v57  ;;  %v3484_v57 = vld [vmem:[#allocation2 + $0xc4] sm:$0xf] }
  0x21   :  { %v2514_v61 = vld [vmem:[#allocation2 + $0x140] sm:$0xf]  ;;  %v3502_v63 = vld [vmem:[#allocation2 + $0x14c] sm:$0xf0]  ;;  %v2387_v4 = vor.u32 %v3470_v60, %v2386_v59  ;;  %1302 = vmatpush.bf16.msra.mxu2 %v2659_v58  ;;  %v2452_v58 = vld [vmem:[#allocation2 + $0xd0] sm:$0xf0] }
  0x22   :  { %v2642_v0 = vld [vmem:[#allocation2 + $0x240] sm:$0xf]  ;;  %v3534_v1 = vld [vmem:[#allocation2 + $0x24c] sm:$0xf0]  ;;  %v2515_v6 = vor.u32 %v3502_v63, %v2514_v61  ;;  %1316 = vmatpush.bf16.msra.mxu3 %v2787_v62  ;;  %v60_v61 = vld [vmem:[%s4013_s0 + $0x8] sm:$0xff]  ;;  %v2599_v63 = vor.u32 %v3520_v41, %v2596_v46 }
  0x23   :  { %v2770_v2 = vld [vmem:[#allocation2 + $0x340] sm:$0xf]  ;;  %v3566_v3 = vld [vmem:[#allocation2 + $0x34c] sm:$0xf0]  ;;  %v2643_v7 = vor.u32 %v3534_v1, %v2642_v0  ;;  %1275 = vmatpush.bf16.msra.mxu0 %v2387_v4  ;;  %v3516_v1 = vld [vmem:[#allocation2 + $0x1c4] sm:$0xf]  ;;  %v2455_v4 = vor.u32 %v3484_v57, %v2452_v58 }
  0x24   :  { %v2370_v5 = vld [vmem:[#allocation2 + $0x20] sm:$0xf]  ;;  %v3466_v8 = vld [vmem:[#allocation2 + $0x2c] sm:$0xf0]  ;;  %v2771_v11 = vor.u32 %v3566_v3, %v2770_v2  ;;  %1289 = vmatpush.bf16.msra.mxu1 %v2515_v6  ;;  %v2580_v2 = vld [vmem:[#allocation2 + $0x1d0] sm:$0xf0] }
  0x25   :  { %v2498_v9 = vld [vmem:[#allocation2 + $0x120] sm:$0xf]  ;;  %v3498_v10 = vld [vmem:[#allocation2 + $0x12c] sm:$0xf0]  ;;  %v2371_v18 = vor.u32 %v3466_v8, %v2370_v5  ;;  %1303 = vmatpush.bf16.msra.mxu2 %v2643_v7  ;;  %v2532_v41 = vld [vmem:[#allocation2 + $0x170] sm:$0xf0] }
  0x26   :  { %v2626_v12 = vld [vmem:[#allocation2 + $0x220] sm:$0xf]  ;;  %v3530_v13 = vld [vmem:[#allocation2 + $0x22c] sm:$0xf0]  ;;  %v2499_v23 = vor.u32 %v3498_v10, %v2498_v9  ;;  %1317 = vmatpush.bf16.msra.mxu3 %v2771_v11  ;;  %v3480_v10 = vld [vmem:[#allocation2 + $0xa4] sm:$0xf] }
  0x27   :  { %v2754_v14 = vld [vmem:[#allocation2 + $0x320] sm:$0xf]  ;;  %v3562_v15 = vld [vmem:[#allocation2 + $0x32c] sm:$0xf0]  ;;  %v2627_v24 = vor.u32 %v3530_v13, %v2626_v12  ;;  %1276 = vmatpush.bf16.msra.mxu0 %v2371_v18  ;;  %v2436_v11 = vld [vmem:[#allocation2 + $0xb0] sm:$0xf0]  ;;  %v2583_v12 = vor.u32 %v3516_v1, %v2580_v2 }
  0x28   :  { %v2354_v16 = vld [vmem:[#allocation2] sm:$0xf]  ;;  %v3462_v17 = vld [vmem:[#allocation2 + $0xc] sm:$0xf0]  ;;  %v2755_v28 = vor.u32 %v3562_v15, %v2754_v14  ;;  %1290 = vmatpush.bf16.msra.mxu1 %v2499_v23  ;;  %v3512_v14 = vld [vmem:[#allocation2 + $0x1a4] sm:$0xf] }
  0x29   :  { %v2482_v19 = vld [vmem:[#allocation2 + $0x100] sm:$0xf]  ;;  %v3494_v20 = vld [vmem:[#allocation2 + $0x10c] sm:$0xf0]  ;;  %v2355_v35 = vor.u32 %v3462_v17, %v2354_v16  ;;  %1304 = vmatpush.bf16.msra.mxu2 %v2627_v24  ;;  %v2564_v15 = vld [vmem:[#allocation2 + $0x1b0] sm:$0xf0]  ;;  %v2439_v17 = vor.u32 %v3480_v10, %v2436_v11 }
  0x2a   :  { %v2610_v21 = vld [vmem:[#allocation2 + $0x200] sm:$0xf]  ;;  %v3526_v22 = vld [vmem:[#allocation2 + $0x20c] sm:$0xf0]  ;;  %v2483_v39 = vor.u32 %v3494_v20, %v2482_v19  ;;  %1318 = vmatpush.bf16.msra.mxu3 %v2755_v28  ;;  %v2420_v23 = vld [vmem:[#allocation2 + $0x90] sm:$0xf0]  ;;  %v2567_v24 = vor.u32 %v3512_v14, %v2564_v15 }
  0x2b   :  { %v2738_v25 = vld [vmem:[#allocation2 + $0x300] sm:$0xf]  ;;  %v3558_v26 = vld [vmem:[#allocation2 + $0x30c] sm:$0xf0]  ;;  %v2611_v40 = vor.u32 %v3526_v22, %v2610_v21  ;;  %1277 = vmatpush.bf16.msra.mxu0 %v2355_v35  ;;  %v3476_v22 = vld [vmem:[#allocation2 + $0x84] sm:$0xf] }
  0x2c   :  { %v2978_v27 = vld [vmem:[#allocation2 + $0x4e0] sm:$0xf]  ;;  %v3618_v29 = vld [vmem:[#allocation2 + $0x4ec] sm:$0xf0]  ;;  %v2739_v44 = vor.u32 %v3558_v26, %v2738_v25  ;;  %1291 = vmatpush.bf16.msra.mxu1 %v2483_v39  ;;  %v3508_v26 = vld [vmem:[#allocation2 + $0x184] sm:$0xf] }
  0x2d   :  { %v3106_v30 = vld [vmem:[#allocation2 + $0x5e0] sm:$0xf]  ;;  %v3650_v31 = vld [vmem:[#allocation2 + $0x5ec] sm:$0xf0]  ;;  %v2979_v45 = vor.u32 %v3618_v29, %v2978_v27  ;;  %1305 = vmatpush.bf16.msra.mxu2 %v2611_v40  ;;  %v2548_v27 = vld [vmem:[#allocation2 + $0x190] sm:$0xf0]  ;;  %v2423_v29 = vor.u32 %v3476_v22, %v2420_v23 }
  0x2e   :  { %v61_v34 = vld [vmem:[%s4013_s0 + $0x10] sm:$0xff]  ;;  %v3122_v37 = vld [vmem:[#allocation2 + $0x600] sm:$0xf]  ;;  %v3107_v49 = vor.u32 %v3650_v31, %v3106_v30  ;;  %1319 = vmatpush.bf16.msra.mxu3 %v2739_v44  ;;  %v3504_v40 = vld [vmem:[#allocation2 + $0x164] sm:$0xf] }
  0x2f   :  { %v3654_v38 = vld [vmem:[#allocation2 + $0x60c] sm:$0xf0]  ;;  %v59_v42 = vld [vmem:[%s4013_s0] sm:$0xff]  ;;  %v3870_v54 = vpack.c.bf16 %v68_v36, %v61_v34  ;;  %1326 = vmatpush.bf16.msrb.mxu0 %v2979_v45  ;;  %v2404_v35 = vld [vmem:[#allocation2 + $0x70] sm:$0xf0] }
  0x30   :  { %v69_v48 = vld [vmem:[%s4013_s0 + $0x50] sm:$0xff]  ;;  %v2962_v51 = vld [vmem:[#allocation2 + $0x4c0] sm:$0xf]  ;;  %v3872_v55 = vpack.c.bf16 %v66_v43, %v59_v42  ;;  %v3123_v59 = vor.u32 %v3654_v38, %v3122_v37  ;;  %1340 = vmatpush.bf16.msrb.mxu1 %v3107_v49  ;;  %v3472_v34 = vld [vmem:[#allocation2 + $0x64] sm:$0xf]  ;;  %v2551_v38 = vor.u32 %v3508_v26, %v2548_v27 }
  0x31   :  { %v3614_v52 = vld [vmem:[#allocation2 + $0x4cc] sm:$0xf0]  ;;  %v3090_v53 = vld [vmem:[#allocation2 + $0x5c0] sm:$0xf]  ;;  %v3874_v60 = vpack.c.bf16 %v69_v48, %v62_v47  ;;  %1306 = vmatmul.bf16.vlgmr.msra.gmra.mxu2 %v3870_v54  ;;  %v72_v37 = vld [vmem:[%s4013_s0 + $0x68] sm:$0xff]  ;;  %v2407_v43 = vor.u32 %v3472_v34, %v2404_v35 }
  0x32   :  { %v3646_v56 = vld [vmem:[#allocation2 + $0x5cc] sm:$0xf0]  ;;  %v67_v62 = vld [vmem:[%s4013_s0 + $0x40] sm:$0xff]  ;;  %v2963_v0 = vor.u32 %v3614_v52, %v2962_v51  ;;  %1368 = vmatpush.bf16.msrb.mxu3 %v2471_v50  ;;  %1278 = vmatmul.bf16.vlgmr.msra.gmra.mxu0 %v3872_v55  ;;  %v2388_v49 = vld [vmem:[#allocation2 + $0x50] sm:$0xf0]  ;;  %v2535_v51 = vor.u32 %v3504_v40, %v2532_v41 }
  0x33   :  { %v3091_v3 = vor.u32 %v3646_v56, %v3090_v53  ;;  %v2946_v5 = vld [vmem:[#allocation2 + $0x4a0] sm:$0xf]  ;;  %v3610_v6 = vld [vmem:[#allocation2 + $0x4ac] sm:$0xf0]  ;;  %v3884_v8 = vpack.c.bf16 %v67_v62, %v60_v61  ;;  %1361 = vmatpush.bf16.msrb.mxu2 %v3123_v59  ;;  %1320 = vmatmul.bf16.vlgmr.msra.gmra.mxu3 %v3874_v60  ;;  %v3468_v48 = vld [vmem:[#allocation2 + $0x44] sm:$0xf] }
  0x34   :  { %v3074_v7 = vld [vmem:[#allocation2 + $0x5a0] sm:$0xf]  ;;  %v3642_v9 = vld [vmem:[#allocation2 + $0x5ac] sm:$0xf0]  ;;  %1327 = vmatpush.bf16.msrb.mxu0 %v2963_v0  ;;  %v2947_v13 = vor.u32 %v3610_v6, %v2946_v5  ;;  %v3500_v53 = vld [vmem:[#allocation2 + $0x144] sm:$0xf]  ;;  %v2391_v58 = vor.u32 %v3468_v48, %v2388_v49 }
  0x35   :  { %1341 = vmatpush.bf16.msrb.mxu1 %v3091_v3  ;;  %v3075_v16 = vor.u32 %v3642_v9, %v3074_v7  ;;  %v2930_v18 = vld [vmem:[#allocation2 + $0x480] sm:$0xf]  ;;  %v3606_v19 = vld [vmem:[#allocation2 + $0x48c] sm:$0xf0]  ;;  %v2516_v56 = vld [vmem:[#allocation2 + $0x150] sm:$0xf0] }
  0x36   :  { %1369 = vmatpush.bf16.msrb.mxu3 %v2455_v4  ;;  %v3058_v20 = vld [vmem:[#allocation2 + $0x580] sm:$0xf]  ;;  %1292 = vmatmul.bf16.vlgmr.msra.gmra.mxu1 %v3884_v8  ;;  %v3638_v21 = vld [vmem:[#allocation2 + $0x58c] sm:$0xf0]  ;;  %v2931_v25 = vor.u32 %v3606_v19, %v2930_v18  ;;  %v3464_v0 = vld [vmem:[#allocation2 + $0x24] sm:$0xf]  ;;  %v2519_v4 = vor.u32 %v3500_v53, %v2516_v56 }
  0x37   :  { %1382 = vmatpush.bf16.msra.mxu2 %v2599_v63  ;;  %v3059_v28 = vor.u32 %v3638_v21, %v3058_v20  ;;  %v2914_v30 = vld [vmem:[#allocation2 + $0x460] sm:$0xf]  ;;  %v3602_v31 = vld [vmem:[#allocation2 + $0x46c] sm:$0xf0]  ;;  %v2372_v1 = vld [vmem:[#allocation2 + $0x30] sm:$0xf0] }
  0x38   :  { %1328 = vmatpush.bf16.msrb.mxu0 %v2947_v13  ;;  %v3042_v32 = vld [vmem:[#allocation2 + $0x560] sm:$0xf]  ;;  %v3634_v33 = vld [vmem:[#allocation2 + $0x56c] sm:$0xf0]  ;;  %v2915_v39 = vor.u32 %v3602_v31, %v2914_v30  ;;  %v3496_v2 = vld [vmem:[#allocation2 + $0x124] sm:$0xf]  ;;  %v2375_v11 = vor.u32 %v3464_v0, %v2372_v1 }
  0x39   :  { %1342 = vmatpush.bf16.msrb.mxu1 %v3075_v16  ;;  %v65_v36 = vld [vmem:[%s4013_s0 + $0x30] sm:$0xff]  ;;  %v3043_v42 = vor.u32 %v3634_v33, %v3042_v32  ;;  %v2898_v44 = vld [vmem:[#allocation2 + $0x440] sm:$0xf]  ;;  %v3460_v13 = vld [vmem:[#allocation2 + $0x4] sm:$0xf] }
  0x3a   :  { %1370 = vmatpush.bf16.msrb.mxu3 %v2439_v17  ;;  %v3598_v45 = vld [vmem:[#allocation2 + $0x44c] sm:$0xf0]  ;;  %v3026_v46 = vld [vmem:[#allocation2 + $0x540] sm:$0xf]  ;;  %v3894_v50 = vpack.c.bf16 %v72_v37, %v65_v36  ;;  %v2500_v3 = vld [vmem:[#allocation2 + $0x130] sm:$0xf0] }
  0x3b   :  { %1383 = vmatpush.bf16.msra.mxu2 %v2583_v12  ;;  %v3630_v47 = vld [vmem:[#allocation2 + $0x54c] sm:$0xf0]  ;;  %v2899_v52 = vor.u32 %v3598_v45, %v2898_v44  ;;  %v2882_v59 = vld [vmem:[#allocation2 + $0x420] sm:$0xf]  ;;  %v2356_v14 = vld [vmem:[#allocation2 + $0x10] sm:$0xf0]  ;;  %v2503_v21 = vor.u32 %v3496_v2, %v2500_v3 }
  0x3c   :  { %1329 = vmatpush.bf16.msrb.mxu0 %v2931_v25  ;;  %v3027_v57 = vor.u32 %v3630_v47, %v3026_v46  ;;  %v3594_v61 = vld [vmem:[#allocation2 + $0x42c] sm:$0xf0]  ;;  %v3010_v62 = vld [vmem:[#allocation2 + $0x520] sm:$0xf]  ;;  %v3552_v15 = vld [vmem:[#allocation2 + $0x2e4] sm:$0xf]  ;;  %v2359_v27 = vor.u32 %v3460_v13, %v2356_v14 }
  0x3d   :  { %1343 = vmatpush.bf16.msrb.mxu1 %v3059_v28  ;;  %v3626_v63 = vld [vmem:[#allocation2 + $0x52c] sm:$0xf0]  ;;  %v2883_v5 = vor.u32 %v3594_v61, %v2882_v59  ;;  %v2866_v6 = vld [vmem:[#allocation2 + $0x400] sm:$0xf]  ;;  %v2724_v16 = vld [vmem:[#allocation2 + $0x2f0] sm:$0xf0] }
  0x3e   :  { %1371 = vmatpush.bf16.msrb.mxu3 %v2423_v29  ;;  %v3590_v7 = vld [vmem:[#allocation2 + $0x40c] sm:$0xf0]  ;;  %v2994_v9 = vld [vmem:[#allocation2 + $0x500] sm:$0xf]  ;;  %v3011_v10 = vor.u32 %v3626_v63, %v3010_v62  ;;  %v3584_v17 = vld [vmem:[#allocation2 + $0x3e4] sm:$0xf]  ;;  %v2727_v31 = vor.u32 %v3552_v15, %v2724_v16 }
  0x3f   :  { %1384 = vmatpush.bf16.msra.mxu2 %v2567_v24  ;;  %v3622_v12 = vld [vmem:[#allocation2 + $0x50c] sm:$0xf0]  ;;  %v2852_v18 = vld [vmem:[#allocation2 + $0x3f0] sm:$0xf0]  ;;  %v3616_v19 = vld [vmem:[#allocation2 + $0x4e4] sm:$0xf]  ;;  %v2867_v22 = vor.u32 %v3590_v7, %v2866_v6 }
  0x40   :  { %1330 = vmatpush.bf16.msrb.mxu0 %v2915_v39  ;;  %v2980_v20 = vld [vmem:[#allocation2 + $0x4f0] sm:$0xf0]  ;;  %v63_v23 = vld [vmem:[%s4013_s0 + $0x20] sm:$0xff]  ;;  %v70_v24 = vld [vmem:[%s4013_s0 + $0x58] sm:$0xff]  ;;  %v2995_v26 = vor.u32 %v3622_v12, %v2994_v9  ;;  %v2855_v32 = vor.u32 %v3584_v17, %v2852_v18 }
  0x41   :  { %1344 = vmatpush.bf16.msrb.mxu1 %v3043_v42  ;;  %3136 = vmatmul.msk.bf16.vlgmr.msrb.gmra.mxu2 %vm1266_vm0, %v3894_v50  ;;  %v3492_v25 = vld [vmem:[#allocation2 + $0x104] sm:$0xf]  ;;  %v2484_v28 = vld [vmem:[#allocation2 + $0x110] sm:$0xf0]  ;;  %v64_v29 = vld [vmem:[%s4013_s0 + $0x28] sm:$0xff]  ;;  %v2983_v36 = vor.u32 %v3616_v19, %v2980_v20  ;;  %v3910_v37 = vpack.c.bf16 %v70_v24, %v63_v23 }
  0x42   :  { %1372 = vmatpush.bf16.msrb.mxu3 %v2407_v43  ;;  %v71_v30 = vld [vmem:[%s4013_s0 + $0x60] sm:$0xff]  ;;  %v3108_v34 = vld [vmem:[#allocation2 + $0x5f0] sm:$0xf0]  ;;  %v2487_v41 = vor.u32 %v3492_v25, %v2484_v28 }
  0x43   :  { %1385 = vmatpush.bf16.msra.mxu2 %v2551_v38  ;;  %v3648_v33 = vld [vmem:[#allocation2 + $0x5e4] sm:$0xf]  ;;  %v2708_v38 = vld [vmem:[#allocation2 + $0x2d0] sm:$0xf0]  ;;  %v3912_v42 = vpack.c.bf16 %v71_v30, %v64_v29 }
  0x44   :  { %1331 = vmatpush.bf16.msrb.mxu0 %v2899_v52  ;;  %v3548_v35 = vld [vmem:[#allocation2 + $0x2c4] sm:$0xf]  ;;  %v2836_v40 = vld [vmem:[#allocation2 + $0x3d0] sm:$0xf0]  ;;  %v3111_v45 = vor.u32 %v3648_v33, %v3108_v34 }
  0x45   :  { %1345 = vmatpush.bf16.msrb.mxu1 %v3027_v57  ;;  %v3580_v39 = vld [vmem:[#allocation2 + $0x3c4] sm:$0xf]  ;;  %v2964_v44 = vld [vmem:[#allocation2 + $0x4d0] sm:$0xf0]  ;;  %v2711_v46 = vor.u32 %v3548_v35, %v2708_v38 }
  0x46   :  { %1373 = vmatpush.bf16.msrb.mxu3 %v2391_v58  ;;  %v3612_v43 = vld [vmem:[#allocation2 + $0x4c4] sm:$0xf]  ;;  %v2839_v47 = vor.u32 %v3580_v39, %v2836_v40  ;;  %v3092_v49 = vld [vmem:[#allocation2 + $0x5d0] sm:$0xf0] }
  0x47   :  { %1386 = vmatpush.bf16.msra.mxu2 %v2535_v51  ;;  %v3644_v48 = vld [vmem:[#allocation2 + $0x5c4] sm:$0xf]  ;;  %v2967_v52 = vor.u32 %v3612_v43, %v2964_v44  ;;  %v2692_v53 = vld [vmem:[#allocation2 + $0x2b0] sm:$0xf0] }
  0x48   :  { %1332 = vmatpush.bf16.msrb.mxu0 %v2883_v5  ;;  %v3544_v51 = vld [vmem:[#allocation2 + $0x2a4] sm:$0xf]  ;;  %v2820_v57 = vld [vmem:[#allocation2 + $0x3b0] sm:$0xf0]  ;;  %v3095_v61 = vor.u32 %v3644_v48, %v3092_v49 }
  0x49   :  { %1346 = vmatpush.bf16.msrb.mxu1 %v3011_v10  ;;  %v3576_v56 = vld [vmem:[#allocation2 + $0x3a4] sm:$0xf]  ;;  %v2948_v59 = vld [vmem:[#allocation2 + $0x4b0] sm:$0xf0]  ;;  %v2695_v62 = vor.u32 %v3544_v51, %v2692_v53 }
  0x4a   :  { %1374 = vmatpush.bf16.msrb.mxu3 %v2375_v11  ;;  %v3608_v58 = vld [vmem:[#allocation2 + $0x4a4] sm:$0xf]  ;;  %v2823_v63 = vor.u32 %v3576_v56, %v2820_v57  ;;  %v3076_v1 = vld [vmem:[#allocation2 + $0x5b0] sm:$0xf0] }
  0x4b   :  { %1387 = vmatpush.bf16.msra.mxu2 %v2519_v4  ;;  %v3640_v0 = vld [vmem:[#allocation2 + $0x5a4] sm:$0xf]  ;;  %v2951_v3 = vor.u32 %v3608_v58, %v2948_v59  ;;  %v2676_v4 = vld [vmem:[#allocation2 + $0x290] sm:$0xf0] }
  0x4c   :  { %1333 = vmatpush.bf16.msrb.mxu0 %v2867_v22  ;;  %v3540_v2 = vld [vmem:[#allocation2 + $0x284] sm:$0xf]  ;;  %v2804_v6 = vld [vmem:[#allocation2 + $0x390] sm:$0xf0]  ;;  %v3079_v10 = vor.u32 %v3640_v0, %v3076_v1  ;;  %v2474_v0 = vld [vmem:[#allocation2 + $0xe8] sm:$0xf] }
  0x4d   :  { %1347 = vmatpush.bf16.msrb.mxu1 %v2995_v26  ;;  %v3572_v5 = vld [vmem:[#allocation2 + $0x384] sm:$0xf]  ;;  %v2932_v9 = vld [vmem:[#allocation2 + $0x490] sm:$0xf0]  ;;  %v2679_v11 = vor.u32 %v3540_v2, %v2676_v4  ;;  %v3491_v1 = vld [vmem:[#allocation2 + $0xf4] sm:$0xf0] }
  0x4e   :  { %1375 = vmatpush.bf16.msrb.mxu3 %v2359_v27  ;;  %v3604_v7 = vld [vmem:[#allocation2 + $0x484] sm:$0xf]  ;;  %v2807_v12 = vor.u32 %v3572_v5, %v2804_v6  ;;  %v3060_v14 = vld [vmem:[#allocation2 + $0x590] sm:$0xf0]  ;;  %v2602_v2 = vld [vmem:[#allocation2 + $0x1e8] sm:$0xf] }
  0x4f   :  { %1388 = vmatpush.bf16.msra.mxu2 %v2503_v21  ;;  %1334 = vmatmul.bf16.vlgmr.msrb.gmra.mxu0 %v3910_v37  ;;  %v3636_v13 = vld [vmem:[#allocation2 + $0x584] sm:$0xf]  ;;  %v2935_v16 = vor.u32 %v3604_v7, %v2932_v9  ;;  %v2660_v17 = vld [vmem:[#allocation2 + $0x270] sm:$0xf0]  ;;  %v3523_v4 = vld [vmem:[#allocation2 + $0x1f4] sm:$0xf0] }
  0x50   :  { %1396 = vmatpush.bf16.msra.mxu0 %v2727_v31  ;;  %1348 = vmatmul.bf16.vlgmr.msrb.gmra.mxu1 %v3912_v42  ;;  %v3536_v15 = vld [vmem:[#allocation2 + $0x264] sm:$0xf]  ;;  %v2788_v19 = vld [vmem:[#allocation2 + $0x370] sm:$0xf0]  ;;  %v3063_v22 = vor.u32 %v3636_v13, %v3060_v14  ;;  %v2475_v13 = vor.u32 %v3491_v1, %v2474_v0  ;;  %v2858_v14 = vld [vmem:[#allocation2 + $0x3e8] sm:$0xf] }
  0x51   :  { %1410 = vmatpush.bf16.msra.mxu1 %v2855_v32  ;;  %1376 = vmatmul.bf16.vlgmr.msrb.gmra.mxu3 %v3872_v55  ;;  %v3568_v18 = vld [vmem:[#allocation2 + $0x364] sm:$0xf]  ;;  %v2916_v21 = vld [vmem:[#allocation2 + $0x470] sm:$0xf0]  ;;  %v2663_v23 = vor.u32 %v3536_v15, %v2660_v17  ;;  %v3587_v15 = vld [vmem:[#allocation2 + $0x3f4] sm:$0xf0]  ;;  %v2603_v17 = vor.u32 %v3523_v4, %v2602_v2 }
  0x52   :  { %1424 = vmatpush.bf16.msra.mxu3 %v2983_v36  ;;  %v3600_v20 = vld [vmem:[#allocation2 + $0x464] sm:$0xf]  ;;  %v2791_v24 = vor.u32 %v3568_v18, %v2788_v19  ;;  %v3044_v26 = vld [vmem:[#allocation2 + $0x570] sm:$0xf0]  ;;  %v3487_v18 = vld [vmem:[#allocation2 + $0xd4] sm:$0xf0] }
  0x53   :  { %1389 = vmatpush.bf16.msra.mxu2 %v2487_v41  ;;  %v3632_v25 = vld [vmem:[#allocation2 + $0x564] sm:$0xf]  ;;  %v2919_v28 = vor.u32 %v3600_v20, %v2916_v21  ;;  %v2644_v29 = vld [vmem:[#allocation2 + $0x250] sm:$0xf0]  ;;  %v2730_v20 = vld [vmem:[#allocation2 + $0x2e8] sm:$0xf] }
  0x54   :  { %1397 = vmatpush.bf16.msra.mxu0 %v2711_v46  ;;  %v3532_v27 = vld [vmem:[#allocation2 + $0x244] sm:$0xf]  ;;  %v2772_v31 = vld [vmem:[#allocation2 + $0x350] sm:$0xf0]  ;;  %v3047_v34 = vor.u32 %v3632_v25, %v3044_v26  ;;  %v3555_v21 = vld [vmem:[#allocation2 + $0x2f4] sm:$0xf0]  ;;  %v2859_v25 = vor.u32 %v3587_v15, %v2858_v14 }
  0x55   :  { %1411 = vmatpush.bf16.msra.mxu1 %v2839_v47  ;;  %v3564_v30 = vld [vmem:[#allocation2 + $0x344] sm:$0xf]  ;;  %v2900_v33 = vld [vmem:[#allocation2 + $0x450] sm:$0xf0]  ;;  %v2647_v35 = vor.u32 %v3532_v27, %v2644_v29  ;;  %v2842_v27 = vld [vmem:[#allocation2 + $0x3c8] sm:$0xf] }
  0x56   :  { %1425 = vmatpush.bf16.msra.mxu3 %v2967_v52  ;;  %1390 = vmatmul.bf16.vlgmr.msra.gmra.mxu2 %v3884_v8  ;;  %v3596_v32 = vld [vmem:[#allocation2 + $0x444] sm:$0xf]  ;;  %v2775_v36 = vor.u32 %v3564_v30, %v2772_v31  ;;  %v3028_v39 = vld [vmem:[#allocation2 + $0x550] sm:$0xf0]  ;;  %v2442_v29 = vld [vmem:[#allocation2 + $0xa8] sm:$0xf]  ;;  %v2731_v30 = vor.u32 %v3555_v21, %v2730_v20 }
  0x57   :  { %1438 = vmatpush.bf16.msrb.mxu2 %v3111_v45  ;;  %v3628_v38 = vld [vmem:[#allocation2 + $0x544] sm:$0xf]  ;;  %v2903_v41 = vor.u32 %v3596_v32, %v2900_v33  ;;  %v2628_v43 = vld [vmem:[#allocation2 + $0x230] sm:$0xf0]  ;;  %v3483_v32 = vld [vmem:[#allocation2 + $0xb4] sm:$0xf0] }
  0x58   :  { %1398 = vmatpush.bf16.msra.mxu0 %v2695_v62  ;;  %v3528_v40 = vld [vmem:[#allocation2 + $0x224] sm:$0xf]  ;;  %v2756_v45 = vld [vmem:[#allocation2 + $0x330] sm:$0xf0]  ;;  %v3031_v48 = vor.u32 %v3628_v38, %v3028_v39  ;;  %v2714_v33 = vld [vmem:[#allocation2 + $0x2c8] sm:$0xf] }
  0x59   :  { %1412 = vmatpush.bf16.msra.mxu1 %v2823_v63  ;;  %v3560_v44 = vld [vmem:[#allocation2 + $0x324] sm:$0xf]  ;;  %v2884_v47 = vld [vmem:[#allocation2 + $0x430] sm:$0xf0]  ;;  %v2631_v52 = vor.u32 %v3528_v40, %v2628_v43  ;;  %v2826_v39 = vld [vmem:[#allocation2 + $0x3a8] sm:$0xf]  ;;  %v2443_v40 = vor.u32 %v3483_v32, %v2442_v29 }
  0x5a   :  { %1426 = vmatpush.bf16.msra.mxu3 %v2951_v3  ;;  %v3592_v46 = vld [vmem:[#allocation2 + $0x424] sm:$0xf]  ;;  %v3012_v51 = vld [vmem:[#allocation2 + $0x530] sm:$0xf0]  ;;  %v2759_v53 = vor.u32 %v3560_v44, %v2756_v45  ;;  %v2426_v43 = vld [vmem:[#allocation2 + $0x88] sm:$0xf] }
  0x5b   :  { %1439 = vmatpush.bf16.msrb.mxu2 %v3095_v61  ;;  %v3624_v49 = vld [vmem:[#allocation2 + $0x524] sm:$0xf]  ;;  %v2612_v57 = vld [vmem:[#allocation2 + $0x210] sm:$0xf0]  ;;  %v2887_v59 = vor.u32 %v3592_v46, %v2884_v47  ;;  %v3479_v46 = vld [vmem:[#allocation2 + $0x94] sm:$0xf0] }
  0x5c   :  { %1399 = vmatpush.bf16.msra.mxu0 %v2679_v11  ;;  %v3524_v56 = vld [vmem:[#allocation2 + $0x204] sm:$0xf]  ;;  %v2740_v61 = vld [vmem:[#allocation2 + $0x310] sm:$0xf0]  ;;  %v3015_v3 = vor.u32 %v3624_v49, %v3012_v51  ;;  %v2698_v47 = vld [vmem:[#allocation2 + $0x2a8] sm:$0xf] }
  0x5d   :  { %1413 = vmatpush.bf16.msra.mxu1 %v2807_v12  ;;  %v3556_v58 = vld [vmem:[#allocation2 + $0x304] sm:$0xf]  ;;  %v2868_v63 = vld [vmem:[#allocation2 + $0x410] sm:$0xf0]  ;;  %v2615_v7 = vor.u32 %v3524_v56, %v2612_v57  ;;  %v2554_v49 = vld [vmem:[#allocation2 + $0x188] sm:$0xf] }
  0x5e   :  { %1427 = vmatpush.bf16.msra.mxu3 %v2935_v16  ;;  %v3588_v62 = vld [vmem:[#allocation2 + $0x404] sm:$0xf]  ;;  %v3124_v6 = vld [vmem:[#allocation2 + $0x610] sm:$0xf0]  ;;  %v2743_v9 = vor.u32 %v3556_v58, %v2740_v61  ;;  %v2458_v16 = vld [vmem:[#allocation2 + $0xc8] sm:$0xf] }
  0x5f   :  { %1440 = vmatpush.bf16.msrb.mxu2 %v3079_v10  ;;  %v3652_v5 = vld [vmem:[#allocation2 + $0x604] sm:$0xf]  ;;  %v2996_v11 = vld [vmem:[#allocation2 + $0x510] sm:$0xf0]  ;;  %v2871_v12 = vor.u32 %v3588_v62, %v2868_v63  ;;  %v2459_v26 = vor.u32 %v3487_v18, %v2458_v16  ;;  %v3511_v51 = vld [vmem:[#allocation2 + $0x194] sm:$0xf0] }
  0x60   :  { %1400 = vmatpush.bf16.msra.mxu0 %v2663_v23  ;;  %v3620_v10 = vld [vmem:[#allocation2 + $0x504] sm:$0xf]  ;;  %v3127_v19 = vor.u32 %v3652_v5, %v3124_v6  ;;  %v2586_v23 = vld [vmem:[#allocation2 + $0x1c8] sm:$0xf]  ;;  %v3575_v57 = vld [vmem:[#allocation2 + $0x394] sm:$0xf0]  ;;  %v2555_v61 = vor.u32 %v3511_v51, %v2554_v49 }
  0x61   :  { %1414 = vmatpush.bf16.msra.mxu1 %v2791_v24  ;;  %v3519_v24 = vld [vmem:[#allocation2 + $0x1d4] sm:$0xf0]  ;;  %v2810_v56 = vld [vmem:[#allocation2 + $0x388] sm:$0xf] }
  0x62   :  { %1428 = vmatpush.bf16.msra.mxu3 %v2919_v28  ;;  %v3583_v28 = vld [vmem:[#allocation2 + $0x3d4] sm:$0xf0]  ;;  %v2587_v31 = vor.u32 %v3519_v24, %v2586_v23  ;;  %v2410_v58 = vld [vmem:[#allocation2 + $0x68] sm:$0xf] }
  0x63   :  { %1441 = vmatpush.bf16.msrb.mxu2 %v3063_v22  ;;  %v2999_v22 = vor.u32 %v3620_v10, %v2996_v11  ;;  %v2843_v38 = vor.u32 %v3583_v28, %v2842_v27  ;;  %v3475_v62 = vld [vmem:[#allocation2 + $0x74] sm:$0xf0]  ;;  %v2682_v63 = vld [vmem:[#allocation2 + $0x288] sm:$0xf] }
  0x64   :  { %1401 = vmatpush.bf16.msra.mxu0 %v2647_v35  ;;  %v2570_v35 = vld [vmem:[#allocation2 + $0x1a8] sm:$0xf]  ;;  %v3543_v0 = vld [vmem:[#allocation2 + $0x294] sm:$0xf0]  ;;  %v2411_v4 = vor.u32 %v3475_v62, %v2410_v58 }
  0x65   :  { %1415 = vmatpush.bf16.msra.mxu1 %v2775_v36  ;;  %v3515_v36 = vld [vmem:[#allocation2 + $0x1b4] sm:$0xf0]  ;;  %v2538_v1 = vld [vmem:[#allocation2 + $0x168] sm:$0xf] }
  0x66   :  { %1429 = vmatpush.bf16.msra.mxu3 %v2903_v41  ;;  %v3579_v41 = vld [vmem:[#allocation2 + $0x3b4] sm:$0xf0]  ;;  %v2571_v45 = vor.u32 %v3515_v36, %v2570_v35  ;;  %v2794_v5 = vld [vmem:[#allocation2 + $0x368] sm:$0xf] }
  0x67   :  { %1442 = vmatpush.bf16.msrb.mxu2 %v3047_v34  ;;  %v3551_v34 = vld [vmem:[#allocation2 + $0x2d4] sm:$0xf0]  ;;  %v2522_v14 = vld [vmem:[#allocation2 + $0x148] sm:$0xf] }
  0x68   :  { %1402 = vmatpush.bf16.msra.mxu0 %v2631_v52  ;;  %v2715_v44 = vor.u32 %v3551_v34, %v2714_v33  ;;  %v2827_v52 = vor.u32 %v3579_v41, %v2826_v39  ;;  %v3507_v2 = vld [vmem:[#allocation2 + $0x174] sm:$0xf0]  ;;  %v2778_v18 = vld [vmem:[#allocation2 + $0x348] sm:$0xf] }
  0x69   :  { %1416 = vmatpush.bf16.msra.mxu1 %v2759_v53  ;;  %v2427_v53 = vor.u32 %v3479_v46, %v2426_v43  ;;  %v3571_v6 = vld [vmem:[#allocation2 + $0x374] sm:$0xf0]  ;;  %v2539_v10 = vor.u32 %v3507_v2, %v2538_v1  ;;  %v2378_v20 = vld [vmem:[#allocation2 + $0x28] sm:$0xf] }
  0x6a   :  { %1430 = vmatpush.bf16.msra.mxu3 %v2887_v59  ;;  %v3471_v11 = vld [vmem:[#allocation2 + $0x54] sm:$0xf0]  ;;  %v2795_v16 = vor.u32 %v3571_v6, %v2794_v5  ;;  %v2650_v24 = vld [vmem:[#allocation2 + $0x248] sm:$0xf] }
  0x6b   :  { %1443 = vmatpush.bf16.msrb.mxu2 %v3031_v48  ;;  %v3547_v48 = vld [vmem:[#allocation2 + $0x2b4] sm:$0xf0]  ;;  %v2762_v29 = vld [vmem:[#allocation2 + $0x328] sm:$0xf] }
  0x6c   :  { %1403 = vmatpush.bf16.msra.mxu0 %v2615_v7  ;;  %v2699_v59 = vor.u32 %v3547_v48, %v2698_v47  ;;  %v2394_v7 = vld [vmem:[#allocation2 + $0x48] sm:$0xf]  ;;  %v3503_v15 = vld [vmem:[#allocation2 + $0x154] sm:$0xf0] }
  0x6d   :  { %1417 = vmatpush.bf16.msra.mxu1 %v2743_v9  ;;  %v2683_v9 = vor.u32 %v3543_v0, %v2682_v63  ;;  %v3467_v23 = vld [vmem:[#allocation2 + $0x34] sm:$0xf0]  ;;  %v2362_v32 = vld [vmem:[#allocation2 + $0x8] sm:$0xf] }
  0x6e   :  { %1431 = vmatpush.bf16.msra.mxu3 %v2871_v12  ;;  %v2666_v12 = vld [vmem:[#allocation2 + $0x268] sm:$0xf]  ;;  %v3499_v27 = vld [vmem:[#allocation2 + $0x134] sm:$0xf0] }
  0x6f   :  { %1444 = vmatpush.bf16.msrb.mxu2 %v3015_v3  ;;  %1404 = vmatmul.bf16.vlgmr.msra.gmra.mxu0 %v3870_v54  ;;  %v2811_v3 = vor.u32 %v3575_v57, %v2810_v56  ;;  %v3463_v33 = vld [vmem:[#allocation2 + $0x14] sm:$0xf0]  ;;  %v2490_v36 = vld [vmem:[#allocation2 + $0x108] sm:$0xf]  ;;  %v2476_v57 = vld [vmem:[#allocation2 + $0xf8] sm:$0xf0] }
  0x70   :  { %1459 = vmatpush.bf16.msrb.mxu0 %v3127_v19  ;;  %1418 = vmatmul.bf16.vlgmr.msra.gmra.mxu1 %v3874_v60  ;;  %v3567_v19 = vld [vmem:[#allocation2 + $0x354] sm:$0xf0]  ;;  %v2986_v41 = vld [vmem:[#allocation2 + $0x4e8] sm:$0xf]  ;;  %v2363_v47 = vor.u32 %v3463_v33, %v2362_v32  ;;  %v3477_v33 = vld [vmem:[#allocation2 + $0x8c] sm:$0xf] }
  0x71   :  { %1466 = vmatpush.bf16.msrb.mxu1 %v2475_v13  ;;  %1432 = vmatmul.bf16.vlgmr.msra.gmra.mxu3 %v3910_v37  ;;  %v3539_v13 = vld [vmem:[#allocation2 + $0x274] sm:$0xf0]  ;;  %v2779_v28 = vor.u32 %v3567_v19, %v2778_v18  ;;  %v2746_v48 = vld [vmem:[#allocation2 + $0x308] sm:$0xf] }
  0x72   :  { %1480 = vmatpush.bf16.msrb.mxu3 %v2603_v17  ;;  %v2395_v17 = vor.u32 %v3471_v11, %v2394_v7  ;;  %v2667_v21 = vor.u32 %v3539_v13, %v2666_v12  ;;  %v3531_v39 = vld [vmem:[#allocation2 + $0x234] sm:$0xf0]  ;;  %v2970_v58 = vld [vmem:[#allocation2 + $0x4c8] sm:$0xf] }
  0x73   :  { %1445 = vmatpush.bf16.msrb.mxu2 %v2999_v22  ;;  %v2523_v22 = vor.u32 %v3503_v15, %v2522_v14  ;;  %v3619_v43 = vld [vmem:[#allocation2 + $0x4f4] sm:$0xf0]  ;;  %v3098_v62 = vld [vmem:[#allocation2 + $0x5c8] sm:$0xf]  ;;  %v3521_v15 = vld [vmem:[#allocation2 + $0x1ec] sm:$0xf] }
  0x74   :  { %1494 = vmatpush.bf16.msra.mxu0 %v2731_v30  ;;  %v2379_v30 = vor.u32 %v3467_v23, %v2378_v20  ;;  %v3651_v46 = vld [vmem:[#allocation2 + $0x5f4] sm:$0xf0]  ;;  %v2987_v56 = vor.u32 %v3619_v43, %v2986_v41  ;;  %v2618_v63 = vld [vmem:[#allocation2 + $0x208] sm:$0xf]  ;;  %v2572_v41 = vld [vmem:[#allocation2 + $0x1b8] sm:$0xf0] }
  0x75   :  { %1467 = vmatpush.bf16.msrb.mxu1 %v2459_v26  ;;  %v2506_v26 = vld [vmem:[#allocation2 + $0x128] sm:$0xf]  ;;  %v3559_v49 = vld [vmem:[#allocation2 + $0x314] sm:$0xf0] }
  0x76   :  { %1481 = vmatpush.bf16.msrb.mxu3 %v2587_v31  ;;  %1446 = vmatmul.bf16.vlgmr.msrb.gmra.mxu2 %v3912_v42  ;;  %v3563_v31 = vld [vmem:[#allocation2 + $0x334] sm:$0xf0]  ;;  %v2507_v35 = vor.u32 %v3499_v27, %v2506_v26  ;;  %v2747_v1 = vor.u32 %v3559_v49, %v2746_v48  ;;  %v2954_v11 = vld [vmem:[#allocation2 + $0x4a8] sm:$0xf]  ;;  %v3517_v27 = vld [vmem:[#allocation2 + $0x1cc] sm:$0xf] }
  0x77   :  { %1508 = vmatpush.bf16.msra.mxu2 %v2859_v25  ;;  %v3535_v25 = vld [vmem:[#allocation2 + $0x254] sm:$0xf0]  ;;  %v3050_v43 = vld [vmem:[#allocation2 + $0x568] sm:$0xf]  ;;  %v2412_v48 = vld [vmem:[#allocation2 + $0x78] sm:$0xf0] }
  0x78   :  { %1495 = vmatpush.bf16.msra.mxu0 %v2715_v44  ;;  %v2651_v34 = vor.u32 %v3535_v25, %v2650_v24  ;;  %v2763_v44 = vor.u32 %v3563_v31, %v2762_v29  ;;  %v3527_v0 = vld [vmem:[#allocation2 + $0x214] sm:$0xf0]  ;;  %v2938_v24 = vld [vmem:[#allocation2 + $0x488] sm:$0xf] }
  0x79   :  { %1468 = vmatpush.bf16.msrb.mxu1 %v2443_v40  ;;  %v3495_v40 = vld [vmem:[#allocation2 + $0x114] sm:$0xf0]  ;;  %v2619_v7 = vor.u32 %v3527_v0, %v2618_v63  ;;  %v3066_v29 = vld [vmem:[#allocation2 + $0x588] sm:$0xf]  ;;  %v3469_v63 = vld [vmem:[#allocation2 + $0x4c] sm:$0xf] }
  0x7a   :  { %1482 = vmatpush.bf16.msrb.mxu3 %v2571_v45  ;;  %v3114_v45 = vld [vmem:[#allocation2 + $0x5e8] sm:$0xf]  ;;  %v3647_v2 = vld [vmem:[#allocation2 + $0x5d4] sm:$0xf0]  ;;  %v2396_v0 = vld [vmem:[#allocation2 + $0x58] sm:$0xf0] }
  0x7b   :  { %1509 = vmatpush.bf16.msra.mxu2 %v2843_v38  ;;  %v2634_v38 = vld [vmem:[#allocation2 + $0x228] sm:$0xf]  ;;  %v3099_v12 = vor.u32 %v3647_v2, %v3098_v62  ;;  %v3611_v13 = vld [vmem:[#allocation2 + $0x4b4] sm:$0xf0] }
  0x7c   :  { %1496 = vmatpush.bf16.msra.mxu0 %v2699_v59  ;;  %v2635_v51 = vor.u32 %v3531_v39, %v2634_v38  ;;  %v3615_v59 = vld [vmem:[#allocation2 + $0x4d4] sm:$0xf0]  ;;  %v2955_v20 = vor.u32 %v3611_v13, %v2954_v11  ;;  %v2890_v2 = vld [vmem:[#allocation2 + $0x428] sm:$0xf]  ;;  %v3465_v11 = vld [vmem:[#allocation2 + $0x2c] sm:$0xf] }
  0x7d   :  { %1469 = vmatpush.bf16.msrb.mxu1 %v2427_v53  ;;  %v2491_v53 = vor.u32 %v3495_v40, %v2490_v36  ;;  %v2971_v6 = vor.u32 %v3615_v59, %v2970_v58  ;;  %v3643_v18 = vld [vmem:[#allocation2 + $0x5b4] sm:$0xf0]  ;;  %v2922_v36 = vld [vmem:[#allocation2 + $0x468] sm:$0xf]  ;;  %v3513_v40 = vld [vmem:[#allocation2 + $0x1ac] sm:$0xf] }
  0x7e   :  { %1483 = vmatpush.bf16.msrb.mxu3 %v2555_v61  ;;  %v3115_v61 = vor.u32 %v3651_v46, %v3114_v45  ;;  %v3607_v26 = vld [vmem:[#allocation2 + $0x494] sm:$0xf0]  ;;  %v2575_v49 = vor.u32 %v3513_v40, %v2572_v41  ;;  %v3034_v58 = vld [vmem:[#allocation2 + $0x548] sm:$0xf]  ;;  %v2380_v13 = vld [vmem:[#allocation2 + $0x38] sm:$0xf0] }
  0x7f   :  { %1510 = vmatpush.bf16.msra.mxu2 %v2827_v52  ;;  %3137 = vmatmul.msk.bf16.vlgmr.msrb.gmra.mxu0 %vm1266_vm0, %v3894_v50  ;;  %v3489_v52 = vld [vmem:[#allocation2 + $0xec] sm:$0xf]  ;;  %v2939_v32 = vor.u32 %v3607_v26, %v2938_v24  ;;  %v3603_v39 = vld [vmem:[#allocation2 + $0x474] sm:$0xf0]  ;;  %v2383_v24 = vor.u32 %v3465_v11, %v2380_v13  ;;  %v2860_v26 = vld [vmem:[#allocation2 + $0x3f8] sm:$0xf0] }
  0x80   :  { %1497 = vmatpush.bf16.msra.mxu0 %v2683_v9  ;;  %v2479_v5 = vor.u32 %v3489_v52, %v2476_v57  ;;  %v3485_v9 = vld [vmem:[#allocation2 + $0xcc] sm:$0xf]  ;;  %v2923_v46 = vor.u32 %v3603_v39, %v2922_v36  ;;  %v2556_v57 = vld [vmem:[#allocation2 + $0x198] sm:$0xf0]  ;;  %v3631_v59 = vld [vmem:[#allocation2 + $0x554] sm:$0xf0] }
  0x81   :  { %1470 = vmatpush.bf16.msrb.mxu1 %v2411_v4  ;;  %v3655_v4 = vld [vmem:[#allocation2 + $0x614] sm:$0xf0]  ;;  %v3497_v39 = vld [vmem:[#allocation2 + $0x12c] sm:$0xf]  ;;  %v2508_v40 = vld [vmem:[#allocation2 + $0x138] sm:$0xf0] }
  0x82   :  { %1484 = vmatpush.bf16.msrb.mxu3 %v2539_v10  ;;  %v2460_v10 = vld [vmem:[#allocation2 + $0xd8] sm:$0xf0]  ;;  %v3645_v11 = vld [vmem:[#allocation2 + $0x5cc] sm:$0xf] }
  0x83   :  { %1511 = vmatpush.bf16.msra.mxu2 %v2811_v3  ;;  %v3130_v3 = vld [vmem:[#allocation2 + $0x608] sm:$0xf]  ;;  %v2463_v19 = vor.u32 %v3485_v9, %v2460_v10  ;;  %v3627_v9 = vld [vmem:[#allocation2 + $0x534] sm:$0xf0]  ;;  %v2399_v10 = vor.u32 %v3469_v63, %v2396_v0 }
  0x84   :  { %1498 = vmatpush.bf16.msra.mxu0 %v2667_v21  ;;  %v3131_v14 = vor.u32 %v3655_v4, %v3130_v3  ;;  %v3481_v21 = vld [vmem:[#allocation2 + $0xac] sm:$0xf]  ;;  %v3035_v3 = vor.u32 %v3631_v59, %v3034_v58  ;;  %v3595_v4 = vld [vmem:[#allocation2 + $0x434] sm:$0xf0]  ;;  %v2492_v58 = vld [vmem:[#allocation2 + $0x118] sm:$0xf0] }
  0x85   :  { %1471 = vmatpush.bf16.msrb.mxu1 %v2395_v17  ;;  %v3082_v17 = vld [vmem:[#allocation2 + $0x5a8] sm:$0xf]  ;;  %v2828_v59 = vld [vmem:[#allocation2 + $0x3b8] sm:$0xf0] }
  0x86   :  { %1485 = vmatpush.bf16.msrb.mxu3 %v2523_v22  ;;  %v2444_v22 = vld [vmem:[#allocation2 + $0xb8] sm:$0xf0]  ;;  %v3083_v25 = vor.u32 %v3643_v18, %v3082_v17  ;;  %v3002_v18 = vld [vmem:[#allocation2 + $0x508] sm:$0xf] }
  0x87   :  { %1512 = vmatpush.bf16.msra.mxu2 %v2795_v16  ;;  %v2604_v16 = vld [vmem:[#allocation2 + $0x1f8] sm:$0xf0]  ;;  %v2447_v31 = vor.u32 %v3481_v21, %v2444_v22  ;;  %v3623_v21 = vld [vmem:[#allocation2 + $0x514] sm:$0xf0]  ;;  %v3553_v22 = vld [vmem:[#allocation2 + $0x2ec] sm:$0xf] }
  0x88   :  { %1499 = vmatpush.bf16.msra.mxu0 %v2651_v34  ;;  %v2607_v23 = vor.u32 %v3521_v15, %v2604_v16  ;;  %v2428_v34 = vld [vmem:[#allocation2 + $0x98] sm:$0xf0]  ;;  %v2874_v15 = vld [vmem:[#allocation2 + $0x408] sm:$0xf]  ;;  %v3591_v16 = vld [vmem:[#allocation2 + $0x414] sm:$0xf0] }
  0x89   :  { %1472 = vmatpush.bf16.msrb.mxu1 %v2379_v30  ;;  %v3639_v30 = vld [vmem:[#allocation2 + $0x594] sm:$0xf0]  ;;  %v2431_v45 = vor.u32 %v3477_v33, %v2428_v34  ;;  %v3617_v33 = vld [vmem:[#allocation2 + $0x4ec] sm:$0xf]  ;;  %v2988_v34 = vld [vmem:[#allocation2 + $0x4f8] sm:$0xf0] }
  0x8a   :  { %1486 = vmatpush.bf16.msrb.mxu3 %v2507_v35  ;;  %v3067_v38 = vor.u32 %v3639_v30, %v3066_v29  ;;  %v2364_v29 = vld [vmem:[#allocation2 + $0x18] sm:$0xf0] }
  0x8b   :  { %1513 = vmatpush.bf16.msra.mxu2 %v2779_v28  ;;  %v2588_v28 = vld [vmem:[#allocation2 + $0x1d8] sm:$0xf0] }
  0x8c   :  { %1500 = vmatpush.bf16.msra.mxu0 %v2635_v51  ;;  %v2591_v35 = vor.u32 %v3517_v27, %v2588_v28  ;;  %v2906_v51 = vld [vmem:[#allocation2 + $0x448] sm:$0xf]  ;;  %v2875_v27 = vor.u32 %v3591_v16, %v2874_v15  ;;  %v3461_v28 = vld [vmem:[#allocation2 + $0xc] sm:$0xf]  ;;  %v2940_v16 = vld [vmem:[#allocation2 + $0x498] sm:$0xf0] }
  0x8d   :  { %1473 = vmatpush.bf16.msrb.mxu1 %v2363_v47  ;;  %v3473_v47 = vld [vmem:[#allocation2 + $0x6c] sm:$0xf]  ;;  %v2367_v41 = vor.u32 %v3461_v28, %v2364_v29 }
  0x8e   :  { %1487 = vmatpush.bf16.msrb.mxu3 %v2491_v53  ;;  %v3599_v53 = vld [vmem:[#allocation2 + $0x454] sm:$0xf0]  ;;  %v3605_v15 = vld [vmem:[#allocation2 + $0x48c] sm:$0xf] }
  0x8f   :  { %1514 = vmatpush.bf16.msra.mxu2 %v2763_v44  ;;  %v3635_v44 = vld [vmem:[#allocation2 + $0x574] sm:$0xf0]  ;;  %v2907_v62 = vor.u32 %v3599_v53, %v2906_v51  ;;  %v3545_v51 = vld [vmem:[#allocation2 + $0x2ac] sm:$0xf] }
  0x90   :  { %1474 = vmatmul.bf16.vlgmr.msrb.gmra.mxu1 %v3872_v55  ;;  %1501 = vmatpush.bf16.msra.mxu0 %v2619_v7  ;;  %v3051_v52 = vor.u32 %v3635_v44, %v3050_v43  ;;  %v3018_v7 = vld [vmem:[#allocation2 + $0x528] sm:$0xf]  ;;  %v3581_v43 = vld [vmem:[#allocation2 + $0x3cc] sm:$0xf]  ;;  %v2844_v44 = vld [vmem:[#allocation2 + $0x3d8] sm:$0xf0] }
  0x91   :  { %1522 = vmatpush.bf16.msra.mxu1 %v2987_v56  ;;  %1488 = vmatmul.bf16.vlgmr.msrb.gmra.mxu3 %v3884_v8  ;;  %v3509_v56 = vld [vmem:[#allocation2 + $0x18c] sm:$0xf]  ;;  %v3019_v17 = vor.u32 %v3627_v9, %v3018_v7  ;;  %v2847_v53 = vor.u32 %v3581_v43, %v2844_v44  ;;  %v2684_v7 = vld [vmem:[#allocation2 + $0x298] sm:$0xf0] }
  0x92   :  { %1536 = vmatpush.bf16.msra.mxu3 %v3115_v61  ;;  %v2415_v61 = vor.u32 %v3473_v47, %v2412_v48  ;;  %v2511_v48 = vor.u32 %v3497_v39, %v2508_v40  ;;  %v3573_v9 = vld [vmem:[#allocation2 + $0x38c] sm:$0xf]  ;;  %v2636_v44 = vld [vmem:[#allocation2 + $0x238] sm:$0xf0] }
  0x93   :  { %1515 = vmatpush.bf16.msra.mxu2 %v2747_v1  ;;  %1502 = vmatmul.bf16.vlgmr.msra.gmra.mxu0 %v3870_v54  ;;  %v2559_v1 = vor.u32 %v3509_v56, %v2556_v57  ;;  %v3577_v56 = vld [vmem:[#allocation2 + $0x3ac] sm:$0xf] }
  0x94   :  { %1557 = vmatpush.bf16.msrb.mxu0 %v3131_v14  ;;  %v3493_v57 = vld [vmem:[#allocation2 + $0x10c] sm:$0xf] }
  0x95   :  { %1523 = vmatpush.bf16.msra.mxu1 %v2971_v6  ;;  %v2540_v6 = vld [vmem:[#allocation2 + $0x178] sm:$0xf0]  ;;  %v3597_v39 = vld [vmem:[#allocation2 + $0x44c] sm:$0xf] }
  0x96   :  { %1537 = vmatpush.bf16.msra.mxu3 %v3099_v12  ;;  %1516 = vmatmul.bf16.vlgmr.msra.gmra.mxu2 %v3874_v60  ;;  %v2891_v12 = vor.u32 %v3595_v4, %v2890_v2  ;;  %v3609_v2 = vld [vmem:[#allocation2 + $0x4ac] sm:$0xf]  ;;  %v2831_v4 = vor.u32 %v3577_v56, %v2828_v59  ;;  %v2892_v56 = vld [vmem:[#allocation2 + $0x438] sm:$0xf0] }
  0x97   :  { %1564 = vmatpush.bf16.msrb.mxu2 %v2479_v5  ;;  %v3505_v5 = vld [vmem:[#allocation2 + $0x16c] sm:$0xf] }
  0x98   :  { %1578 = vmatpush.bf16.msra.mxu0 %v2607_v23  ;;  %v2543_v14 = vor.u32 %v3505_v5, %v2540_v6  ;;  %v2732_v23 = vld [vmem:[#allocation2 + $0x2f8] sm:$0xf0]  ;;  %v3541_v6 = vld [vmem:[#allocation2 + $0x28c] sm:$0xf] }
  0x99   :  { %1524 = vmatpush.bf16.msra.mxu1 %v2955_v20  ;;  %v2524_v20 = vld [vmem:[#allocation2 + $0x158] sm:$0xf0]  ;;  %v3529_v43 = vld [vmem:[#allocation2 + $0x22c] sm:$0xf] }
  0x9a   :  { %1538 = vmatpush.bf16.msra.mxu3 %v3083_v25  ;;  %v3585_v25 = vld [vmem:[#allocation2 + $0x3ec] sm:$0xf] }
  0x9b   :  { %1565 = vmatpush.bf16.msrb.mxu2 %v2463_v19  ;;  %v3501_v19 = vld [vmem:[#allocation2 + $0x14c] sm:$0xf]  ;;  %v2863_v36 = vor.u32 %v3585_v25, %v2860_v26 }
  0x9c   :  { %1579 = vmatpush.bf16.msra.mxu0 %v2591_v35  ;;  %v2527_v30 = vor.u32 %v3501_v19, %v2524_v20  ;;  %v3549_v35 = vld [vmem:[#allocation2 + $0x2cc] sm:$0xf] }
  0x9d   :  { %1525 = vmatpush.bf16.msra.mxu1 %v2939_v32  ;;  %v2735_v32 = vor.u32 %v3553_v22, %v2732_v23  ;;  %v3537_v19 = vld [vmem:[#allocation2 + $0x26c] sm:$0xf]  ;;  %v3084_v23 = vld [vmem:[#allocation2 + $0x5b8] sm:$0xf0] }
  0x9e   :  { %1539 = vmatpush.bf16.msra.mxu3 %v3067_v38  ;;  %v2716_v38 = vld [vmem:[#allocation2 + $0x2d8] sm:$0xf0]  ;;  %v3569_v20 = vld [vmem:[#allocation2 + $0x36c] sm:$0xf] }
  0x9f   :  { %1566 = vmatpush.bf16.msrb.mxu2 %v2447_v31  ;;  %v3003_v31 = vor.u32 %v3623_v21, %v3002_v18  ;;  %v2719_v47 = vor.u32 %v3549_v35, %v2716_v38  ;;  %v2796_v21 = vld [vmem:[#allocation2 + $0x378] sm:$0xf0]  ;;  %v3641_v22 = vld [vmem:[#allocation2 + $0x5ac] sm:$0xf] }
  0xa0   :  { %1580 = vmatpush.bf16.msra.mxu0 %v2575_v49  ;;  %v2972_v49 = vld [vmem:[#allocation2 + $0x4d8] sm:$0xf0]  ;;  %v3601_v26 = vld [vmem:[#allocation2 + $0x46c] sm:$0xf]  ;;  %v2799_v28 = vor.u32 %v3569_v20, %v2796_v21  ;;  %v3087_v29 = vor.u32 %v3641_v22, %v3084_v23  ;;  %v3190_v23 = vld [vmem:[#allocation4 + $0x60] sm:$0xf] }
  0xa1   :  { %1526 = vmatpush.bf16.msra.mxu1 %v2923_v46  ;;  %v3613_v46 = vld [vmem:[#allocation2 + $0x4cc] sm:$0xf]  ;;  %v3068_v35 = vld [vmem:[#allocation2 + $0x598] sm:$0xf0] }
  0xa2   :  { %1540 = vmatpush.bf16.msra.mxu3 %v3051_v52  ;;  %v2700_v52 = vld [vmem:[#allocation2 + $0x2b8] sm:$0xf0]  ;;  %v2975_v63 = vor.u32 %v3613_v46, %v2972_v49 }
  0xa3   :  { %1567 = vmatpush.bf16.msrb.mxu2 %v2431_v45  ;;  %3138 = vmatmul.msk.bf16.vlgmr.msrb.gmra.mxu0 %vm1266_vm0, %v3894_v50  ;;  %v2991_v45 = vor.u32 %v3617_v33, %v2988_v34  ;;  %v2703_v0 = vor.u32 %v3545_v51, %v2700_v52  ;;  %v2780_v33 = vld [vmem:[#allocation2 + $0x358] sm:$0xf0]  ;;  %v3637_v34 = vld [vmem:[#allocation2 + $0x58c] sm:$0xf]  ;;  %v3937_v51 = vld [vmem:[%s4015_s2] sm:$0xf]  ;;  %v2639_v52 = vor.u32 %v3529_v43, %v2636_v44 }
  0xa4   :  { %1581 = vmatpush.bf16.msra.mxu0 %v2559_v1  ;;  %v2495_v1 = vor.u32 %v3493_v57, %v2492_v58  ;;  %v2764_v46 = vld [vmem:[#allocation2 + $0x338] sm:$0xf0]  ;;  %v3525_v57 = vld [vmem:[#allocation2 + $0x20c] sm:$0xf] }
  0xa5   :  { %1527 = vmatpush.bf16.msra.mxu1 %v2907_v62  ;;  %v3116_v62 = vld [vmem:[#allocation2 + $0x5f8] sm:$0xf0] }
  0xa6   :  { %1541 = vmatpush.bf16.msra.mxu3 %v3035_v3  ;;  %v2956_v3 = vld [vmem:[#allocation2 + $0x4b8] sm:$0xf0] }
  0xa7   :  { %1568 = vmatpush.bf16.msrb.mxu2 %v2415_v61  ;;  %v3649_v61 = vld [vmem:[#allocation2 + $0x5ec] sm:$0xf]  ;;  %v2959_v13 = vor.u32 %v3609_v2, %v2956_v3  ;;  %v3198_v2 = vld [vmem:[#allocation4 + $0x70] sm:$0xf]  ;;  %v3020_v20 = vld [vmem:[#allocation2 + $0x538] sm:$0xf0] }
  0xa8   :  { %1582 = vmatpush.bf16.msra.mxu0 %v2543_v14  ;;  %v3119_v5 = vor.u32 %v3649_v61, %v3116_v62  ;;  %v2687_v14 = vor.u32 %v3541_v6, %v2684_v7  ;;  %v2620_v62 = vld [vmem:[#allocation2 + $0x218] sm:$0xf0]  ;;  %v3629_v3 = vld [vmem:[#allocation2 + $0x54c] sm:$0xf]  ;;  %v3671_v7 = vld [vmem:[#allocation4 + $0x74] sm:$0xf0] }
  0xa9   :  { %1528 = vmatpush.bf16.msra.mxu1 %v2891_v12  ;;  %v3100_v12 = vld [vmem:[#allocation2 + $0x5d8] sm:$0xf0] }
  0xaa   :  { %1542 = vmatpush.bf16.msra.mxu3 %v3019_v17  ;;  %v3103_v18 = vor.u32 %v3645_v11, %v3100_v12  ;;  %v2623_v11 = vor.u32 %v3525_v57, %v2620_v62  ;;  %v3589_v12 = vld [vmem:[#allocation2 + $0x40c] sm:$0xf] }
  0xab   :  { %1569 = vmatpush.bf16.msrb.mxu2 %v2399_v10  ;;  %v2812_v10 = vld [vmem:[#allocation2 + $0x398] sm:$0xf0] }
  0xac   :  { %1583 = vmatpush.bf16.msra.mxu0 %v2527_v30  ;;  %v2815_v17 = vor.u32 %v3573_v9, %v2812_v10  ;;  %v3533_v30 = vld [vmem:[#allocation2 + $0x24c] sm:$0xf]  ;;  %v3262_v9 = vld [vmem:[#allocation4 + $0xf0] sm:$0xf]  ;;  %v3687_v10 = vld [vmem:[#allocation4 + $0xf4] sm:$0xf0] }
  0xad   :  { %1529 = vmatpush.bf16.msra.mxu1 %v2875_v27  ;;  %v2924_v27 = vld [vmem:[#allocation2 + $0x478] sm:$0xf0]  ;;  %v3263_v21 = vor.u32 %v3687_v10, %v3262_v9  ;;  %v3222_v10 = vld [vmem:[#allocation4 + $0xa0] sm:$0xf] }
  0xae   :  { %1543 = vmatpush.bf16.msra.mxu3 %v3003_v31  ;;  %v2652_v31 = vld [vmem:[#allocation2 + $0x258] sm:$0xf0] }
  0xaf   :  { %1570 = vmatpush.bf16.msrb.mxu2 %v2383_v24  ;;  %v2943_v24 = vor.u32 %v3605_v15, %v2940_v16  ;;  %v2655_v38 = vor.u32 %v3533_v30, %v2652_v31  ;;  %v1279_v58 = vpop.f32.mrf.mxu0  ;;  %v3621_v31 = vld [vmem:[#allocation2 + $0x50c] sm:$0xf] }
  0xb0   :  { %1530 = vmatmul.bf16.vlgmr.msra.gmra.mxu1 %v3910_v37  ;;  %1584 = vmatpush.bf16.msra.mxu0 %v2511_v48  ;;  %v3052_v48 = vld [vmem:[#allocation2 + $0x578] sm:$0xf0] }
  0xb1   :  { %1592 = vmatpush.bf16.msrb.mxu1 %v2735_v32  ;;  %1544 = vmatmul.bf16.vlgmr.msra.gmra.mxu3 %v3912_v42  ;;  %v3565_v32 = vld [vmem:[#allocation2 + $0x34c] sm:$0xf] }
  0xb2   :  { %1606 = vmatpush.bf16.msrb.mxu3 %v2863_v36  ;;  %v2927_v36 = vor.u32 %v3601_v26, %v2924_v27  ;;  %v2783_v40 = vor.u32 %v3565_v32, %v2780_v33  ;;  %v3254_v26 = vld [vmem:[#allocation4 + $0xe0] sm:$0xf]  ;;  %v3685_v27 = vld [vmem:[#allocation4 + $0xe4] sm:$0xf0]  ;;  %v3004_v32 = vld [vmem:[#allocation2 + $0x518] sm:$0xf0] }
  0xb3   :  { %1571 = vmatpush.bf16.msrb.mxu2 %v2367_v41  ;;  %v3071_v41 = vor.u32 %v3637_v34, %v3068_v35  ;;  %v3182_v34 = vld [vmem:[#allocation4 + $0x50] sm:$0xf]  ;;  %v3667_v35 = vld [vmem:[#allocation4 + $0x54] sm:$0xf0]  ;;  %v3007_v44 = vor.u32 %v3621_v31, %v3004_v32  ;;  %v3206_v31 = vld [vmem:[#allocation4 + $0x80] sm:$0xf] }
  0xb4   :  { %1585 = vmatpush.bf16.msra.mxu0 %v2495_v1  ;;  %v1293_v1 = vpop.f32.mrf.mxu1  ;;  %v3673_v32 = vld [vmem:[#allocation4 + $0x84] sm:$0xf0] }
  0xb5   :  { %1593 = vmatpush.bf16.msrb.mxu1 %v2719_v47  ;;  %v3633_v47 = vld [vmem:[#allocation2 + $0x56c] sm:$0xf] }
  0xb6   :  { %1607 = vmatpush.bf16.msrb.mxu3 %v2847_v53  ;;  %1572 = vmatmul.bf16.vlgmr.msrb.gmra.mxu2 %v3872_v55  ;;  %v2668_v55 = vld [vmem:[#allocation2 + $0x278] sm:$0xf0]  ;;  %v3593_v53 = vld [vmem:[#allocation2 + $0x42c] sm:$0xf]  ;;  %v3055_v61 = vor.u32 %v3633_v47, %v3052_v48  ;;  %v3665_v47 = vld [vmem:[#allocation4 + $0x44] sm:$0xf0] }
  0xb7   :  { %1620 = vmatpush.bf16.msra.mxu2 %v2991_v45  ;;  %1586 = vmatmul.bf16.vlgmr.msra.gmra.mxu0 %v3884_v8  ;;  %v2671_v25 = vor.u32 %v3537_v19, %v2668_v55  ;;  %v2908_v8 = vld [vmem:[#allocation2 + $0x458] sm:$0xf0]  ;;  %v3561_v45 = vld [vmem:[#allocation2 + $0x32c] sm:$0xf]  ;;  %v2895_v6 = vor.u32 %v3593_v53, %v2892_v56  ;;  %v3199_v19 = vor.u32 %v3671_v7, %v3198_v2  ;;  %v1281_v33 = vpop.f32.mrf.mxu0  ;;  %v3661_v7 = vld [vmem:[#allocation4 + $0x24] sm:$0xf0] }
  0xb8   :  { %1634 = vmatpush.bf16.msrb.mxu0 %v3119_v5  ;;  %v2911_v49 = vor.u32 %v3597_v39, %v2908_v8  ;;  %v2767_v59 = vor.u32 %v3561_v45, %v2764_v46  ;;  %v3939_v5 = vpop.f32.mrf.mxu2  ;;  %v3625_v55 = vld [vmem:[#allocation2 + $0x52c] sm:$0xf]  ;;  %v3246_v39 = vld [vmem:[#allocation4 + $0xd0] sm:$0xf]  ;;  %v3683_v8 = vld [vmem:[#allocation4 + $0xd4] sm:$0xf0] }
  0xb9   :  { %1594 = vmatpush.bf16.msrb.mxu1 %v2703_v0  ;;  %v2748_v0 = vld [vmem:[#allocation2 + $0x318] sm:$0xf0]  ;;  %v3174_v46 = vld [vmem:[#allocation4 + $0x40] sm:$0xf]  ;;  %v3247_v48 = vor.u32 %v3683_v8, %v3246_v39 }
  0xba   :  { %1608 = vmatpush.bf16.msrb.mxu3 %v2831_v4  ;;  %v3036_v4 = vld [vmem:[#allocation2 + $0x558] sm:$0xf0]  ;;  %v3175_v56 = vor.u32 %v3665_v47, %v3174_v46 }
  0xbb   :  { %1621 = vmatpush.bf16.msra.mxu2 %v2975_v63  ;;  %v3557_v63 = vld [vmem:[#allocation2 + $0x30c] sm:$0xf]  ;;  %v3039_v16 = vor.u32 %v3629_v3, %v3036_v4 }
  0xbc   :  { %1635 = vmatpush.bf16.msrb.mxu0 %v3103_v18  ;;  %v2751_v15 = vor.u32 %v3557_v63, %v2748_v0  ;;  %v3132_v18 = vld [vmem:[#allocation2 + $0x618] sm:$0xf0]  ;;  %v3679_v63 = vld [vmem:[#allocation4 + $0xb4] sm:$0xf0] }
  0xbd   :  { %1595 = vmatpush.bf16.msrb.mxu1 %v2687_v14  ;;  %v278_v14 = vperm.slane %v3937_v51, 0 }
  0xbe   :  { %1609 = vmatpush.bf16.msrb.mxu3 %v2815_v17  ;;  %v3653_v17 = vld [vmem:[#allocation2 + $0x60c] sm:$0xf] }
  0xbf   :  { %1622 = vmatpush.bf16.msra.mxu2 %v2959_v13  ;;  %v2876_v13 = vld [vmem:[#allocation2 + $0x418] sm:$0xf0]  ;;  %v1282_v45 = vadd.f32 %v1281_v33, %v278_v14  ;;  %v3686_v33 = vld [vmem:[#allocation4 + $0xf4] sm:$0xf] }
  0xc0   :  { %1636 = vmatpush.bf16.msrb.mxu0 %v3087_v29  ;;  %v2879_v22 = vor.u32 %v3589_v12, %v2876_v13  ;;  %v3023_v29 = vor.u32 %v3625_v55, %v3020_v20  ;;  %v1309_v43 = vpop.f32.mrf.mxu2  ;;  %v3214_v55 = vld [vmem:[#allocation4 + $0x90] sm:$0xf]  ;;  %v3675_v20 = vld [vmem:[#allocation4 + $0x94] sm:$0xf0] }
  0xc1   :  { %1596 = vmatpush.bf16.msrb.mxu1 %v2671_v25  ;;  %v3135_v25 = vor.u32 %v3653_v17, %v3132_v18 }
  0xc2   :  { %1610 = vmatpush.bf16.msrb.mxu3 %v2799_v28  ;;  %v1280_v28 = vadd.f32 %v1279_v58, %v278_v14  ;;  %v3166_v58 = vld [vmem:[#allocation4 + $0x30] sm:$0xf] }
  0xc3   :  { %1623 = vmatpush.bf16.msra.mxu2 %v2943_v24  ;;  %v3669_v24 = vld [vmem:[#allocation4 + $0x64] sm:$0xf0] }
  0xc4   :  { %1637 = vmatpush.bf16.msrb.mxu0 %v3071_v41  ;;  %v3191_v30 = vor.u32 %v3669_v24, %v3190_v23  ;;  %v1321_v41 = vpop.f32.mrf.mxu3 }
  0xc5   :  { %1597 = vmatpush.bf16.msrb.mxu1 %v2655_v38  ;;  %v1295_v38 = vpop.f32.mrf.mxu1 }
  0xc6   :  { %1611 = vmatpush.bf16.msrb.mxu3 %v2783_v40  ;;  %v1294_v40 = vadd.f32 %v1293_v1, %v1280_v28  ;;  %v1296_v53 = vadd.f32 %v1295_v38, %v1282_v45  ;;  %v3215_v28 = vor.u32 %v3675_v20, %v3214_v55  ;;  %v3684_v45 = vld [vmem:[#allocation4 + $0xe4] sm:$0xf]  ;;  %v3224_v55 = vld [vmem:[#allocation4 + $0xa8] sm:$0xf0]  ;;  %v3318_v20 = vld [vmem:[#allocation4 + $0x160] sm:$0xf] }
  0xc7   :  { %1624 = vmatpush.bf16.msra.mxu2 %v2927_v36  ;;  %v3255_v36 = vor.u32 %v3685_v27, %v3254_v26  ;;  %v3657_v26 = vld [vmem:[#allocation4 + $0x4] sm:$0xf0]  ;;  %v3670_v27 = vld [vmem:[#allocation4 + $0x74] sm:$0xf] }
  0xc8   :  { %1638 = vmatpush.bf16.msrb.mxu0 %v3055_v61  ;;  %v1363_v1 = vpop.f32.mrf.mxu2  ;;  %v1310_v2 = vadd.f32 %v1309_v43, %v1296_v53  ;;  %v3248_v53 = vld [vmem:[#allocation4 + $0xd8] sm:$0xf0] }
  0xc9   :  { %1598 = vmatpush.bf16.msrb.mxu1 %v2639_v52  ;;  %v3681_v52 = vld [vmem:[#allocation4 + $0xc4] sm:$0xf0] }
  0xca   :  { %1612 = vmatpush.bf16.msrb.mxu3 %v2767_v59  ;;  %v3663_v59 = vld [vmem:[#allocation4 + $0x34] sm:$0xf0] }
  0xcb   :  { %1625 = vmatpush.bf16.msra.mxu2 %v2911_v49  ;;  %v3238_v49 = vld [vmem:[#allocation4 + $0xc0] sm:$0xf]  ;;  %v3167_v3 = vor.u32 %v3663_v59, %v3166_v58  ;;  %v3664_v58 = vld [vmem:[#allocation4 + $0x44] sm:$0xf]  ;;  %v3176_v59 = vld [vmem:[#allocation4 + $0x48] sm:$0xf0] }
  0xcc   :  { %1639 = vmatpush.bf16.msrb.mxu0 %v3039_v16  ;;  %v1335_v57 = vpop.f32.mrf.mxu0  ;;  %v3239_v61 = vor.u32 %v3681_v52, %v3238_v49  ;;  %v1323_v4 = vpop.f32.mrf.mxu3  ;;  %v3659_v16 = vld [vmem:[#allocation4 + $0x14] sm:$0xf0]  ;;  %v3184_v49 = vld [vmem:[#allocation4 + $0x58] sm:$0xf0] }
  0xcd   :  { %1599 = vmatpush.bf16.msrb.mxu1 %v2623_v11  ;;  %v1349_v62 = vpop.f32.mrf.mxu1  ;;  %v3677_v11 = vld [vmem:[#allocation4 + $0xa4] sm:$0xf0]  ;;  %v1324_v12 = vadd.f32 %v1323_v4, %v1310_v2  ;;  %v3662_v2 = vld [vmem:[#allocation4 + $0x34] sm:$0xf] }
  0xce   :  { %1613 = vmatpush.bf16.msrb.mxu3 %v2751_v15  ;;  %v3150_v15 = vld [vmem:[#allocation4 + $0x10] sm:$0xf]  ;;  %v3223_v17 = vor.u32 %v3677_v11, %v3222_v10  ;;  %v3232_v10 = vld [vmem:[#allocation4 + $0xb8] sm:$0xf0]  ;;  %v3703_v11 = vld [vmem:[#allocation4 + $0x174] sm:$0xf0] }
  0xcf   :  { %1626 = vmatpush.bf16.msra.mxu2 %v2895_v6  ;;  %v3158_v6 = vld [vmem:[#allocation4 + $0x20] sm:$0xf] }
  0xd0   :  { %1600 = vmatmul.bf16.vlgmr.msrb.gmra.mxu1 %v3870_v54  ;;  %1640 = vmatpush.bf16.msrb.mxu0 %v3023_v29  ;;  %v3183_v54 = vor.u32 %v3667_v35, %v3182_v34  ;;  %v3159_v13 = vor.u32 %v3661_v7, %v3158_v6  ;;  %v1365_v24 = vpop.f32.mrf.mxu2  ;;  %v3264_v34 = vld [vmem:[#allocation4 + $0xf8] sm:$0xf0] }
  0xd1   :  { %2078 = vmatpush.bf16.msra.mxu1 %v3263_v21  ;;  %1614 = vmatmul.bf16.vlgmr.msrb.gmra.mxu3 %v3874_v60  ;;  %v1308_v60 = vadd.f32 %v3939_v5, %v1294_v40  ;;  %v3668_v40 = vld [vmem:[#allocation4 + $0x64] sm:$0xf]  ;;  %v3267_v43 = vor.u32 %v3686_v33, %v3264_v34  ;;  %v3310_v33 = vld [vmem:[#allocation4 + $0x150] sm:$0xf] }
  0xd2   :  { %2064 = vmatpush.bf16.msra.mxu3 %v3199_v19 }
  0xd3   :  { %1627 = vmatpush.bf16.msra.mxu2 %v2879_v22  ;;  %v1322_v0 = vadd.f32 %v1321_v41, %v1308_v60  ;;  %v3151_v22 = vor.u32 %v3659_v16, %v3150_v15  ;;  %v3192_v41 = vld [vmem:[#allocation4 + $0x68] sm:$0xf0]  ;;  %v3682_v60 = vld [vmem:[#allocation4 + $0xd4] sm:$0xf]  ;;  %v3660_v16 = vld [vmem:[#allocation4 + $0x24] sm:$0xf] }
  0xd4   :  { %1641 = vmatpush.bf16.msrb.mxu0 %v3007_v44  ;;  %v1377_v8 = vpop.f32.mrf.mxu3  ;;  %v3195_v47 = vor.u32 %v3668_v40, %v3192_v41 }
  0xd5   :  { %2079 = vmatpush.bf16.msra.mxu1 %v3255_v36  ;;  %v1336_v5 = vadd.f32 %v1335_v57, %v1322_v0  ;;  %v1351_v19 = vpop.f32.mrf.mxu1  ;;  %v279_v57 = vperm.slane %v3937_v51, 1  ;;  %v3179_v0 = vor.u32 %v3664_v58, %v3176_v59  ;;  %v3294_v58 = vld [vmem:[#allocation4 + $0x130] sm:$0xf]  ;;  %v3695_v59 = vld [vmem:[#allocation4 + $0x134] sm:$0xf0] }
  0xd6   :  { %2065 = vmatpush.bf16.msra.mxu3 %v3191_v30  ;;  %1628 = vmatmul.bf16.vlgmr.msra.gmra.mxu2 %v3910_v37  ;;  %v3230_v37 = vld [vmem:[#allocation4 + $0xb0] sm:$0xf]  ;;  %v3200_v30 = vld [vmem:[#allocation4 + $0x78] sm:$0xf0] }
  0xd7   :  { %1655 = vmatpush.bf16.msrb.mxu2 %v3135_v25  ;;  %1642 = vmatmul.bf16.vlgmr.msrb.gmra.mxu0 %v3912_v42  ;;  %v3231_v9 = vor.u32 %v3679_v63, %v3230_v37  ;;  %v1350_v14 = vadd.f32 %v1349_v62, %v1336_v5  ;;  %v1337_v42 = vpop.f32.mrf.mxu0  ;;  %v3142_v25 = vld [vmem:[#allocation4] sm:$0xf]  ;;  %v3203_v39 = vor.u32 %v3670_v27, %v3200_v30  ;;  %v3680_v62 = vld [vmem:[#allocation4 + $0xc4] sm:$0xf]  ;;  %v3240_v37 = vld [vmem:[#allocation4 + $0xc8] sm:$0xf0] }
  0xd8   :  { %v1338_v18 = vadd.f32 %v1337_v42, %v1324_v12  ;;  %v3143_v36 = vor.u32 %v3657_v26, %v3142_v25  ;;  %v3243_v4 = vor.u32 %v3680_v62, %v3240_v37  ;;  %v3326_v5 = vld [vmem:[#allocation4 + $0x170] sm:$0xf]  ;;  %v3658_v26 = vld [vmem:[#allocation4 + $0x14] sm:$0xf]  ;;  %v3152_v27 = vld [vmem:[#allocation4 + $0x18] sm:$0xf0] }
  0xd9   :  { %2080 = vmatpush.bf16.msra.mxu1 %v3247_v48  ;;  %v1364_v23 = vadd.f32 %v1363_v1, %v1350_v14  ;;  %v1391_v46 = vpop.f32.mrf.mxu2  ;;  %v3666_v48 = vld [vmem:[#allocation4 + $0x54] sm:$0xf]  ;;  %v1378_v1 = vadd.f32 %v1377_v8, %v279_v57  ;;  %v3327_v12 = vor.u32 %v3703_v11, %v3326_v5  ;;  %v3144_v8 = vld [vmem:[#allocation4 + $0x8] sm:$0xf0]  ;;  %v3691_v11 = vld [vmem:[#allocation4 + $0x114] sm:$0xf0] }
  0xda   :  { %2066 = vmatpush.bf16.msra.mxu3 %v3183_v54  ;;  %v1352_v21 = vadd.f32 %v1351_v19, %v1338_v18  ;;  %v3256_v54 = vld [vmem:[#allocation4 + $0xe8] sm:$0xf0]  ;;  %v3676_v19 = vld [vmem:[#allocation4 + $0xa4] sm:$0xf] }
  0xdb   :  { %v1662_v38 = vmax.f32 %v1364_v23, 0.0  ;;  %v3259_v52 = vor.u32 %v3684_v45, %v3256_v54  ;;  %v1392_v14 = vadd.f32 %v1391_v46, %v1378_v1  ;;  %2092 = vmatpush.bf16.msra.mxu2 %v3327_v12  ;;  %v3672_v45 = vld [vmem:[#allocation4 + $0x84] sm:$0xf]  ;;  %v3208_v54 = vld [vmem:[#allocation4 + $0x88] sm:$0xf0] }
  0xdc   :  { %v1366_v29 = vadd.f32 %v1365_v24, %v1352_v21  ;;  %v1379_v63 = vpop.f32.mrf.mxu3 }
  0xdd   :  { %2081 = vmatpush.bf16.msra.mxu1 %v3239_v61  ;;  %v3251_v61 = vor.u32 %v3682_v60, %v3248_v53  ;;  %v1380_v42 = vadd.f32 %v1379_v63, %v279_v57  ;;  %v3697_v60 = vld [vmem:[#allocation4 + $0x144] sm:$0xf0]  ;;  %v3286_v63 = vld [vmem:[#allocation4 + $0x120] sm:$0xf] }
  0xde   :  { %2067 = vmatpush.bf16.msra.mxu3 %v3175_v56  ;;  %v1666_v35 = vmax.f32 %v1366_v29, 0.0  ;;  %v3187_v56 = vor.u32 %v3666_v48, %v3184_v49  ;;  %v3211_v49 = vor.u32 %v3672_v45, %v3208_v54  ;;  %v3690_v54 = vld [vmem:[#allocation4 + $0x114] sm:$0xf] }
  0xe0   :  { %v3949_v44 = vpack.c.bf16 %v1666_v35, %v1662_v38  ;;  %v3155_v35 = vor.u32 %v3658_v26, %v3152_v27 }
  0xe1   :  { %2082 = vmatpush.bf16.msra.mxu1 %v3231_v9  ;;  %v1393_v7 = vpop.f32.mrf.mxu2  ;;  %v3678_v9 = vld [vmem:[#allocation4 + $0xb4] sm:$0xf] }
  0xe2   :  { %2068 = vmatpush.bf16.msra.mxu3 %v3167_v3  ;;  %v3168_v3 = vld [vmem:[#allocation4 + $0x38] sm:$0xf0]  ;;  %v3235_v18 = vor.u32 %v3678_v9, %v3232_v10  ;;  %v1394_v24 = vadd.f32 %v1393_v7, %v1380_v42  ;;  %v3278_v10 = vld [vmem:[#allocation4 + $0x110] sm:$0xf]  ;;  %v3689_v42 = vld [vmem:[#allocation4 + $0x104] sm:$0xf0] }
  0xe3   :  { %v3279_v12 = vor.u32 %v3691_v11, %v3278_v10 }
  0xe5   :  { %2083 = vmatpush.bf16.msra.mxu1 %v3223_v17  ;;  %v3160_v17 = vld [vmem:[#allocation4 + $0x28] sm:$0xf0] }
  0xe6   :  { %2069 = vmatpush.bf16.msra.mxu3 %v3159_v13  ;;  %3139 = vmatmul.msk.bf16.vlgmr.msrb.gmra.mxu2 %vm1266_vm0, %v3894_v50  ;;  %v3207_v50 = vor.u32 %v3673_v32, %v3206_v31  ;;  %v3171_v13 = vor.u32 %v3662_v2, %v3168_v3  ;;  %v3163_v21 = vor.u32 %v3660_v16, %v3160_v17  ;;  %v3674_v31 = vld [vmem:[#allocation4 + $0x94] sm:$0xf]  ;;  %v3216_v32 = vld [vmem:[#allocation4 + $0x98] sm:$0xf0] }
  0xe7   :  { %v3219_v40 = vor.u32 %v3674_v31, %v3216_v32  ;;  %v3702_v16 = vld [vmem:[#allocation4 + $0x174] sm:$0xf]  ;;  %v3390_v32 = vld [vmem:[#allocation4 + $0x1f0] sm:$0xf] }
  0xe9   :  { %2084 = vmatpush.bf16.msra.mxu1 %v3215_v28  ;;  %v3227_v28 = vor.u32 %v3676_v19, %v3224_v55  ;;  %v3320_v19 = vld [vmem:[#allocation4 + $0x168] sm:$0xf0] }
  0xea   :  { %2070 = vmatpush.bf16.msra.mxu3 %v3151_v22  ;;  %v3701_v22 = vld [vmem:[#allocation4 + $0x164] sm:$0xf0] }
  0xeb   :  { %v3319_v29 = vor.u32 %v3701_v22, %v3318_v20  ;;  %v3698_v20 = vld [vmem:[#allocation4 + $0x154] sm:$0xf] }
  0xec   :  { %v1405_v6 = vpop.f32.mrf.mxu0 }
  0xed   :  { %2085 = vmatpush.bf16.msra.mxu1 %v3207_v50  ;;  %v1419_v15 = vpop.f32.mrf.mxu1  ;;  %v1406_v23 = vadd.f32 %v1405_v6, %v1392_v14  ;;  %2093 = vmatpush.bf16.msra.mxu2 %v3319_v29  ;;  %v3656_v50 = vld [vmem:[#allocation4 + $0x4] sm:$0xf]  ;;  %v3270_v14 = vld [vmem:[#allocation4 + $0x100] sm:$0xf]  ;;  %v3694_v29 = vld [vmem:[#allocation4 + $0x134] sm:$0xf] }
  0xee   :  { %2071 = vmatpush.bf16.msra.mxu3 %v3143_v36  ;;  %v3699_v36 = vld [vmem:[#allocation4 + $0x154] sm:$0xf0]  ;;  %v3147_v46 = vor.u32 %v3656_v50, %v3144_v8  ;;  %v3382_v8 = vld [vmem:[#allocation4 + $0x1e0] sm:$0xf] }
  0xef   :  { %v1420_v38 = vadd.f32 %v1419_v15, %v1406_v23  ;;  %v3311_v41 = vor.u32 %v3699_v36, %v3310_v33  ;;  %v3271_v15 = vor.u32 %v3689_v42, %v3270_v14  ;;  %v3719_v33 = vld [vmem:[#allocation4 + $0x1f4] sm:$0xf0]  ;;  %v3692_v36 = vld [vmem:[#allocation4 + $0x124] sm:$0xf]  ;;  %v3350_v14 = vld [vmem:[#allocation4 + $0x1a0] sm:$0xf] }
  0xf0   :  { %v3709_v42 = vld [vmem:[#allocation4 + $0x1a4] sm:$0xf0] }
  0xf1   :  { %2134 = vmatpush.bf16.msrb.mxu1 %v3267_v43  ;;  %2072 = vmatmul.bf16.vlgmr.msra.gmra.mxu3 %v3949_v44 }
  0xf2   :  { %2120 = vmatpush.bf16.msrb.mxu3 %v3203_v39  ;;  %2094 = vmatpush.bf16.msra.mxu2 %v3311_v41 }
  0xf4   :  { %v1433_v25 = vpop.f32.mrf.mxu3  ;;  %v1407_v30 = vpop.f32.mrf.mxu0 }
  0xf5   :  { %2135 = vmatpush.bf16.msrb.mxu1 %v3259_v52  ;;  %v1408_v39 = vadd.f32 %v1407_v30, %v1394_v24  ;;  %v1421_v43 = vpop.f32.mrf.mxu1  ;;  %v3302_v52 = vld [vmem:[#allocation4 + $0x140] sm:$0xf]  ;;  %v3696_v24 = vld [vmem:[#allocation4 + $0x144] sm:$0xf]  ;;  %v3296_v30 = vld [vmem:[#allocation4 + $0x138] sm:$0xf0] }
  0xf6   :  { %2121 = vmatpush.bf16.msrb.mxu3 %v3195_v47  ;;  %v1434_v47 = vadd.f32 %v1433_v25, %v1420_v38  ;;  %v3303_v57 = vor.u32 %v3697_v60, %v3302_v52  ;;  %v3304_v25 = vld [vmem:[#allocation4 + $0x148] sm:$0xf0]  ;;  %v3299_v31 = vor.u32 %v3694_v29, %v3296_v30  ;;  %v3715_v60 = vld [vmem:[#allocation4 + $0x1d4] sm:$0xf0] }
  0xf7   :  { %v1422_v48 = vadd.f32 %v1421_v43, %v1408_v39  ;;  %v3307_v27 = vor.u32 %v3696_v24, %v3304_v25  ;;  %v3288_v38 = vld [vmem:[#allocation4 + $0x128] sm:$0xf0]  ;;  %v3334_v24 = vld [vmem:[#allocation4 + $0x180] sm:$0xf]  ;;  %v3705_v25 = vld [vmem:[#allocation4 + $0x184] sm:$0xf0] }
  0xf8   :  { %2095 = vmatpush.bf16.msra.mxu2 %v3303_v57  ;;  %v3291_v50 = vor.u32 %v3692_v36, %v3288_v38  ;;  %v3384_v36 = vld [vmem:[#allocation4 + $0x1e8] sm:$0xf0] }
  0xf9   :  { %2136 = vmatpush.bf16.msrb.mxu1 %v3251_v61  ;;  %v1447_v34 = vpop.f32.mrf.mxu2  ;;  %v3295_v61 = vor.u32 %v3695_v59, %v3294_v58  ;;  %v3688_v59 = vld [vmem:[#allocation4 + $0x104] sm:$0xf] }
  0xfa   :  { %2122 = vmatpush.bf16.msrb.mxu3 %v3187_v56  ;;  %v1448_v62 = vadd.f32 %v1447_v34, %v1434_v47  ;;  %v280_v34 = vperm.slane %v3937_v51, 2  ;;  %v3374_v47 = vld [vmem:[#allocation4 + $0x1d0] sm:$0xf] }
  0xfb   :  { %v3375_v57 = vor.u32 %v3715_v60, %v3374_v47  ;;  %v3360_v47 = vld [vmem:[#allocation4 + $0x1b8] sm:$0xf0]  ;;  %v281_v60 = vperm.slane %v3937_v51, 3 }
  0xfc   :  { %v1435_v53 = vpop.f32.mrf.mxu3  ;;  %v1461_v56 = vpop.f32.mrf.mxu0  ;;  %2096 = vmatpush.bf16.msra.mxu2 %v3295_v61  ;;  %v3272_v61 = vld [vmem:[#allocation4 + $0x108] sm:$0xf0] }
  0xfd   :  { %2137 = vmatpush.bf16.msrb.mxu1 %v3243_v4  ;;  %v1436_v37 = vadd.f32 %v1435_v53, %v1422_v48  ;;  %v1462_v3 = vadd.f32 %v1461_v56, %v1448_v62  ;;  %v3275_v62 = vor.u32 %v3688_v59, %v3272_v61  ;;  %v3706_v61 = vld [vmem:[#allocation4 + $0x194] sm:$0xf] }
  0xfe   :  { %2123 = vmatpush.bf16.msrb.mxu3 %v3179_v0  ;;  %v3693_v0 = vld [vmem:[#allocation4 + $0x124] sm:$0xf0] }
  0xff   :  { %v3287_v2 = vor.u32 %v3693_v0, %v3286_v63  ;;  %v1663_v7 = vmax.f32 %v1462_v3, 0.0  ;;  %v3713_v63 = vld [vmem:[#allocation4 + $0x1c4] sm:$0xf0] }
 0x101   :  { %2138 = vmatpush.bf16.msrb.mxu1 %v3235_v18  ;;  %v1449_v1 = vpop.f32.mrf.mxu2  ;;  %2097 = vmatpush.bf16.msra.mxu2 %v3287_v2  ;;  %v3700_v18 = vld [vmem:[#allocation4 + $0x164] sm:$0xf] }
 0x102   :  { %2124 = vmatpush.bf16.msrb.mxu3 %v3171_v13  ;;  %v1450_v4 = vadd.f32 %v1449_v1, %v1436_v37  ;;  %v3323_v55 = vor.u32 %v3700_v18, %v3320_v19  ;;  %v3366_v37 = vld [vmem:[#allocation4 + $0x1c0] sm:$0xf]  ;;  %v3342_v19 = vld [vmem:[#allocation4 + $0x190] sm:$0xf] }
 0x103   :  { %v3367_v2 = vor.u32 %v3713_v63, %v3366_v37 }
 0x104   :  { %v1463_v5 = vpop.f32.mrf.mxu0 }
 0x105   :  { %2139 = vmatpush.bf16.msrb.mxu1 %v3227_v28  ;;  %v1464_v6 = vadd.f32 %v1463_v5, %v1450_v4  ;;  %2098 = vmatpush.bf16.msra.mxu2 %v3279_v12  ;;  %v3358_v5 = vld [vmem:[#allocation4 + $0x1b0] sm:$0xf] }
 0x106   :  { %2125 = vmatpush.bf16.msrb.mxu3 %v3163_v21  ;;  %v3312_v21 = vld [vmem:[#allocation4 + $0x158] sm:$0xf0] }
 0x107   :  { %v1667_v9 = vmax.f32 %v1464_v6, 0.0  ;;  %v3315_v23 = vor.u32 %v3698_v20, %v3312_v21  ;;  %v3711_v6 = vld [vmem:[#allocation4 + $0x1b4] sm:$0xf0] }
 0x108   :  { %v3359_v10 = vor.u32 %v3711_v6, %v3358_v5 }
 0x109   :  { %2140 = vmatpush.bf16.msrb.mxu1 %v3219_v40  ;;  %v1671_v13 = vpack.c.bf16 %v1667_v9, %v1663_v7  ;;  %2099 = vmatpush.bf16.msra.mxu2 %v3271_v15  ;;  %v3717_v40 = vld [vmem:[#allocation4 + $0x1e4] sm:$0xf0] }
 0x10a   :  { %2126 = vmatpush.bf16.msrb.mxu3 %v3155_v35  ;;  %v3391_v35 = vor.u32 %v3719_v33, %v3390_v32  ;;  %v3383_v43 = vor.u32 %v3717_v40, %v3382_v8  ;;  %v3392_v32 = vld [vmem:[#allocation4 + $0x1f8] sm:$0xf0] }
 0x10b   :  { %2086 = vmatmul.bf16.vlgmr.msra.gmra.mxu1 %v1671_v13 }
 0x10c   :  { %2106 = vmatpush.bf16.msra.mxu0 %v3391_v35  ;;  %v3716_v35 = vld [vmem:[#allocation4 + $0x1e4] sm:$0xf] }
 0x10d   :  { %2141 = vmatpush.bf16.msrb.mxu1 %v3211_v49  ;;  %v1475_v22 = vpop.f32.mrf.mxu1  ;;  %v3387_v38 = vor.u32 %v3716_v35, %v3384_v36  ;;  %v3731_v35 = vld [vmem:[%s4018_s5 + $0x58] sm:$0xff]  ;;  %v3730_v36 = vld [vmem:[%s4018_s5 + $0x50] sm:$0xff] }
 0x10e   :  { %2127 = vmatpush.bf16.msrb.mxu3 %v3147_v46  ;;  %v1476_v41 = vadd.f32 %v1475_v22, %v280_v34  ;;  %v3280_v46 = vld [vmem:[#allocation4 + $0x118] sm:$0xf0] }
 0x10f   :  { %v3283_v52 = vor.u32 %v3690_v54, %v3280_v46  ;;  %v3710_v46 = vld [vmem:[#allocation4 + $0x1b4] sm:$0xf] }
 0x110   :  { %v1503_v26 = vpop.f32.mrf.mxu0  ;;  %2107 = vmatpush.bf16.msra.mxu0 %v3383_v43  ;;  %v3712_v43 = vld [vmem:[#allocation4 + $0x1c4] sm:$0xf] }
 0x111   :  { %2128 = vmatmul.bf16.vlgmr.msrb.gmra.mxu3 %v3949_v44  ;;  %v3328_v44 = vld [vmem:[#allocation4 + $0x178] sm:$0xf0] }
 0x112   :  { %v3331_v17 = vor.u32 %v3702_v16, %v3328_v44  ;;  %v3351_v44 = vor.u32 %v3709_v42, %v3350_v14 }
 0x114   :  { %2148 = vmatpush.bf16.msrb.mxu2 %v3331_v17  ;;  %v1489_v28 = vpop.f32.mrf.mxu3  ;;  %2108 = vmatpush.bf16.msra.mxu0 %v3375_v57  ;;  %v3708_v57 = vld [vmem:[#allocation4 + $0x1a4] sm:$0xf] }
 0x115   :  { %v1477_v39 = vpop.f32.mrf.mxu1  ;;  %v1490_v53 = vadd.f32 %v1489_v28, %v1476_v41 }
 0x116   :  { %v1478_v56 = vadd.f32 %v1477_v39, %v280_v34  ;;  %v3714_v39 = vld [vmem:[#allocation4 + $0x1d4] sm:$0xf] }
 0x117   :  { %v1504_v0 = vadd.f32 %v1503_v26, %v1490_v53 }
 0x118   :  { %2149 = vmatpush.bf16.msrb.mxu2 %v3323_v55  ;;  %v1505_v45 = vpop.f32.mrf.mxu0  ;;  %2109 = vmatpush.bf16.msra.mxu0 %v3367_v2  ;;  %v3707_v55 = vld [vmem:[#allocation4 + $0x194] sm:$0xf0] }
 0x119   :  { %v1517_v48 = vpop.f32.mrf.mxu2  ;;  %v3343_v22 = vor.u32 %v3707_v55, %v3342_v19 }
 0x11a   :  { %v1518_v7 = vadd.f32 %v1517_v48, %v1504_v0  ;;  %v3363_v48 = vor.u32 %v3710_v46, %v3360_v47  ;;  %v3704_v0 = vld [vmem:[#allocation4 + $0x184] sm:$0xf] }
 0x11b   :  { %2142 = vmatmul.bf16.vlgmr.msrb.gmra.mxu1 %v1671_v13 }
 0x11c   :  { %2150 = vmatpush.bf16.msrb.mxu2 %v3315_v23  ;;  %v1491_v49 = vpop.f32.mrf.mxu3  ;;  %2110 = vmatpush.bf16.msra.mxu0 %v3359_v10 }
 0x11d   :  { %v1492_v1 = vadd.f32 %v1491_v49, %v1478_v56 }
 0x11f   :  { %v1506_v9 = vadd.f32 %v1505_v45, %v1492_v1  ;;  %v3368_v45 = vld [vmem:[#allocation4 + $0x1c8] sm:$0xf0] }
 0x120   :  { %2151 = vmatpush.bf16.msrb.mxu2 %v3307_v27  ;;  %v1559_v3 = vpop.f32.mrf.mxu0  ;;  %2111 = vmatpush.bf16.msra.mxu0 %v3351_v44  ;;  %v3335_v27 = vor.u32 %v3705_v25, %v3334_v24  ;;  %v3371_v54 = vor.u32 %v3712_v43, %v3368_v45  ;;  %v3336_v1 = vld [vmem:[#allocation4 + $0x188] sm:$0xf0]  ;;  %v3726_v24 = vld [vmem:[%s4018_s5 + $0x30] sm:$0xff] }
 0x121   :  { %v1519_v11 = vpop.f32.mrf.mxu2  ;;  %v3339_v5 = vor.u32 %v3704_v0, %v3336_v1  ;;  %v3725_v25 = vld [vmem:[%s4018_s5 + $0x28] sm:$0xff] }
 0x122   :  { %v1520_v15 = vadd.f32 %v1519_v11, %v1506_v9 }
 0x124   :  { %2152 = vmatpush.bf16.msrb.mxu2 %v3299_v31  ;;  %2112 = vmatpush.bf16.msra.mxu0 %v3343_v22  ;;  %v3718_v31 = vld [vmem:[#allocation4 + $0x1f4] sm:$0xf] }
 0x125   :  { %v3395_v33 = vor.u32 %v3718_v31, %v3392_v32  ;;  %v3721_v31 = vld [vmem:[%s4018_s5 + $0x8] sm:$0xff] }
 0x126   :  { %v3733_v32 = vld [vmem:[%s4018_s5 + $0x68] sm:$0xff] }
 0x128   :  { %2153 = vmatpush.bf16.msrb.mxu2 %v3291_v50  ;;  %v1561_v23 = vpop.f32.mrf.mxu0  ;;  %2113 = vmatpush.bf16.msra.mxu0 %v3335_v27  ;;  %v3376_v50 = vld [vmem:[#allocation4 + $0x1d8] sm:$0xf0] }
 0x129   :  { %v3379_v8 = vor.u32 %v3714_v39, %v3376_v50  ;;  %v3723_v27 = vld [vmem:[%s4018_s5 + $0x18] sm:$0xff] }
 0x12c   :  { %2154 = vmatpush.bf16.msrb.mxu2 %v3283_v52  ;;  %2162 = vmatpush.bf16.msrb.mxu0 %v3395_v33  ;;  %v3720_v33 = vld [vmem:[%s4018_s5] sm:$0xff] }
 0x12d   :  { %v1531_v58 = vpop.f32.mrf.mxu1 }
 0x12e   :  { %v1532_v12 = vadd.f32 %v1531_v58, %v1518_v7  ;;  %v3352_v58 = vld [vmem:[#allocation4 + $0x1a8] sm:$0xf0] }
 0x12f   :  { %v3355_v59 = vor.u32 %v3708_v57, %v3352_v58 }
 0x130   :  { %2155 = vmatpush.bf16.msrb.mxu2 %v3275_v62  ;;  %2163 = vmatpush.bf16.msrb.mxu0 %v3387_v38  ;;  %v3344_v62 = vld [vmem:[#allocation4 + $0x198] sm:$0xf0] }
 0x131   :  { %v3347_v63 = vor.u32 %v3706_v61, %v3344_v62 }
 0x134   :  { %v1545_v4 = vpop.f32.mrf.mxu3  ;;  %v1587_v40 = vpop.f32.mrf.mxu0  ;;  %2164 = vmatpush.bf16.msrb.mxu0 %v3379_v8  ;;  %v3729_v8 = vld [vmem:[%s4018_s5 + $0x48] sm:$0xff] }
 0x135   :  { %v1533_v13 = vpop.f32.mrf.mxu1  ;;  %v1546_v16 = vadd.f32 %v1545_v4, %v1532_v12 }
 0x136   :  { %v1534_v17 = vadd.f32 %v1533_v13, %v1520_v15 }
 0x137   :  { %v1560_v20 = vadd.f32 %v1559_v3, %v1546_v16 }
 0x138   :  { %2165 = vmatpush.bf16.msrb.mxu0 %v3371_v54 }
 0x139   :  { %v1664_v28 = vmax.f32 %v1560_v20, 0.0  ;;  %v1573_v30 = vpop.f32.mrf.mxu2 }
 0x13a   :  { %v1574_v37 = vadd.f32 %v1573_v30, %v281_v60  ;;  %v3734_v30 = vld [vmem:[%s4018_s5 + $0x70] sm:$0xff] }
 0x13c   :  { %v1547_v18 = vpop.f32.mrf.mxu3  ;;  %2166 = vmatpush.bf16.msrb.mxu0 %v3363_v48  ;;  %v1589_v53 = vpop.f32.mrf.mxu0  ;;  %v1588_v4 = vadd.f32 %v1587_v40, %v1574_v37  ;;  %v1738_v40 = vld [vmem:[%s4017_s4] sm:$0x3] }
 0x13d   :  { %v1548_v21 = vadd.f32 %v1547_v18, %v1534_v17  ;;  %v1740_v43 = vperm.slane %v1738_v40, 0  ;;  %v1741_v1 = vperm.slane %v1738_v40, 1 }
 0x13f   :  { %v1562_v26 = vadd.f32 %v1561_v23, %v1548_v21  ;;  %v3727_v23 = vld [vmem:[%s4018_s5 + $0x38] sm:$0xff] }
 0x140   :  { %2167 = vmatpush.bf16.msrb.mxu0 %v3355_v59  ;;  %2314 = vmatpush.bf16.msra.mxu3 %v3727_v23 }
 0x141   :  { %v1668_v29 = vmax.f32 %v1562_v26, 0.0  ;;  %v1575_v41 = vpop.f32.mrf.mxu2  ;;  %v3724_v26 = vld [vmem:[%s4018_s5 + $0x20] sm:$0xff] }
 0x142   :  { %v1576_v2 = vadd.f32 %v1575_v41, %v281_v60  ;;  %v3728_v41 = vld [vmem:[%s4018_s5 + $0x40] sm:$0xff] }
 0x143   :  { %v1672_v34 = vpack.c.bf16 %v1668_v29, %v1664_v28  ;;  %v3735_v28 = vld [vmem:[%s4018_s5 + $0x78] sm:$0xff]  ;;  %v3722_v29 = vld [vmem:[%s4018_s5 + $0x10] sm:$0xff] }
 0x144   :  { %2168 = vmatpush.bf16.msrb.mxu0 %v3347_v63  ;;  %v1590_v7 = vadd.f32 %v1589_v53, %v1576_v2  ;;  %2315 = vmatpush.bf16.msra.mxu3 %v3726_v24 }
 0x145   :  { %2100 = vmatmul.bf16.vlgmr.msra.gmra.mxu2 %v1672_v34  ;;  %2328 = vmatpush.bf16.msra.mxu1 %v3735_v28 }
 0x148   :  { %2169 = vmatpush.bf16.msrb.mxu0 %v3339_v5  ;;  %2316 = vmatpush.bf16.msra.mxu3 %v3725_v25 }
 0x149   :  { %2329 = vmatpush.bf16.msra.mxu1 %v3734_v30 }
 0x14c   :  { %2317 = vmatpush.bf16.msra.mxu3 %v3724_v26 }
 0x14d   :  { %v1601_v49 = vpop.f32.mrf.mxu1  ;;  %2330 = vmatpush.bf16.msra.mxu1 %v3733_v32 }
 0x14e   :  { %v1602_v9 = vadd.f32 %v1601_v49, %v1588_v4 }
 0x150   :  { %2318 = vmatpush.bf16.msra.mxu3 %v3723_v27 }
 0x154   :  { %v1615_v56 = vpop.f32.mrf.mxu3  ;;  %v1643_v6 = vpop.f32.mrf.mxu0  ;;  %2319 = vmatpush.bf16.msra.mxu3 %v3722_v29 }
 0x155   :  { %2156 = vmatmul.bf16.vlgmr.msrb.gmra.mxu2 %v1672_v34  ;;  %v1603_v51 = vpop.f32.mrf.mxu1  ;;  %v1616_v11 = vadd.f32 %v1615_v56, %v1602_v9  ;;  %v3732_v34 = vld [vmem:[%s4018_s5 + $0x60] sm:$0xff] }
 0x156   :  { %v1604_v12 = vadd.f32 %v1603_v51, %v1590_v7  ;;  %2331 = vmatpush.bf16.msra.mxu1 %v3732_v34 }
 0x158   :  { %2320 = vmatpush.bf16.msra.mxu3 %v3721_v31 }
 0x159   :  { %v1629_v52 = vpop.f32.mrf.mxu2 }
 0x15a   :  { %v1630_v42 = vadd.f32 %v1629_v52, %v1616_v11  ;;  %2332 = vmatpush.bf16.msra.mxu1 %v3731_v35 }
 0x15c   :  { %v1617_v10 = vpop.f32.mrf.mxu3  ;;  %v1645_v16 = vpop.f32.mrf.mxu0  ;;  %v1644_v44 = vadd.f32 %v1643_v6, %v1630_v42  ;;  %2321 = vmatpush.bf16.msra.mxu3 %v3720_v33 }
 0x15d   :  { %v1618_v13 = vadd.f32 %v1617_v10, %v1604_v12 }
 0x15e   :  { %2333 = vmatpush.bf16.msra.mxu1 %v3730_v36 }
 0x161   :  { %v1631_v3 = vpop.f32.mrf.mxu2 }
 0x162   :  { %v1632_v15 = vadd.f32 %v1631_v3, %v1618_v13  ;;  %2334 = vmatpush.bf16.msra.mxu1 %v3729_v8 }
 0x164   :  { %v1646_v17 = vadd.f32 %v1645_v16, %v1632_v15 }
 0x166   :  { %2335 = vmatpush.bf16.msra.mxu1 %v3728_v41 }
 0x169   :  { %v1657_v14 = vpop.f32.mrf.mxu2 }
 0x16a   :  { %v1658_v18 = vadd.f32 %v1657_v14, %v1644_v44 }
 0x16c   :  { %v1665_v20 = vmax.f32 %v1658_v18, 0.0 }
 0x171   :  { %v1659_v19 = vpop.f32.mrf.mxu2 }
 0x172   :  { %v1660_v55 = vadd.f32 %v1659_v19, %v1646_v17  ;;  %v3747_v19 = vld [vmem:[%s4019_s6] ss:$0 sm:$0xff] }
 0x174   :  { %v1669_v21 = vmax.f32 %v1660_v55, 0.0  ;;  %v2073_v38 = vpop.f32.mrf.mxu3 }
 0x175   :  { %v2074_v48 = vadd.f32 %v2073_v38, %v1740_v43 }
 0x176   :  { %v1673_v22 = vpack.c.bf16 %v1669_v21, %v1665_v20 }
 0x178   :  { %2114 = vmatmul.bf16.vlgmr.msra.gmra.mxu0 %v1673_v22 }
 0x17c   :  { %v2075_v45 = vpop.f32.mrf.mxu3 }
 0x17d   :  { %v2076_v49 = vadd.f32 %v2075_v45, %v1740_v43 }
 0x188   :  { %2170 = vmatmul.bf16.vlgmr.msrb.gmra.mxu0 %v1673_v22  ;;  %v2087_v39 = vpop.f32.mrf.mxu1 }
 0x189   :  { %v2088_v52 = vadd.f32 %v2087_v39, %v2074_v48 }
 0x190   :  { %v2089_v54 = vpop.f32.mrf.mxu1 }
 0x191   :  { %v2090_v60 = vadd.f32 %v2089_v54, %v2076_v49 }
 0x194   :  { %v2129_v56 = vpop.f32.mrf.mxu3 }
 0x195   :  { %v2130_v5 = vadd.f32 %v2129_v56, %v1741_v1 }
 0x198   :  { %v2143_v59 = vpop.f32.mrf.mxu1 }
 0x199   :  { %v2144_v7 = vadd.f32 %v2143_v59, %v2130_v5 }
 0x19c   :  { %v2131_v3 = vpop.f32.mrf.mxu3 }
 0x19d   :  { %v2132_v6 = vadd.f32 %v2131_v3, %v1741_v1 }
 0x1a0   :  { %v2145_v51 = vpop.f32.mrf.mxu1 }
 0x1a1   :  { %v2146_v10 = vadd.f32 %v2145_v51, %v2132_v6 }
 0x1c8   :  { %v2101_v50 = vpop.f32.mrf.mxu2 }
 0x1c9   :  { %v2102_v53 = vadd.f32 %v2101_v50, %v2088_v52 }
 0x1d0   :  { %v2103_v46 = vpop.f32.mrf.mxu2 }
 0x1d1   :  { %v2104_v57 = vadd.f32 %v2103_v46, %v2090_v60 }
 0x1d8   :  { %v2157_v37 = vpop.f32.mrf.mxu2 }
 0x1d9   :  { %v2158_v11 = vadd.f32 %v2157_v37, %v2144_v7 }
 0x1e0   :  { %v2159_v9 = vpop.f32.mrf.mxu2 }
 0x1e1   :  { %v2160_v12 = vadd.f32 %v2159_v9, %v2146_v10 }
 0x1f5   :  { %v2115_v47 = vpop.f32.mrf.mxu0 }
 0x1f6   :  { %v2116_v58 = vadd.f32 %v2115_v47, %v2102_v53 }
 0x1f8   :  { %v2176_v63 = vmax.f32 %v2116_v58, 0.0 }
 0x1fd   :  { %v2117_v61 = vpop.f32.mrf.mxu0 }
 0x1fe   :  { %v2118_v62 = vadd.f32 %v2117_v61, %v2104_v57 }
 0x200   :  { %v2178_v0 = vmax.f32 %v2118_v62, 0.0 }
 0x202   :  { %v2180_v2 = vpack.c.bf16 %v2178_v0, %v2176_v63 }
 0x204   :  { %2322 = vmatmul.bf16.vlgmr.msra.gmra.mxu3 %v2180_v2 }
 0x205   :  { %v2171_v4 = vpop.f32.mrf.mxu0 }
 0x206   :  { %v2172_v13 = vadd.f32 %v2171_v4, %v2158_v11 }
 0x208   :  { %v2177_v15 = vmax.f32 %v2172_v13, 0.0 }
 0x20d   :  { %v2173_v14 = vpop.f32.mrf.mxu0 }
 0x20e   :  { %v2174_v42 = vadd.f32 %v2173_v14, %v2160_v12 }
 0x210   :  { %v2179_v16 = vmax.f32 %v2174_v42, 0.0 }
 0x212   :  { %v2181_v44 = vpack.c.bf16 %v2179_v16, %v2177_v15 }
 0x214   :  { %2336 = vmatmul.bf16.vlgmr.msra.gmra.mxu1 %v2181_v44 }
 0x287   :  { %v2323_v17 = vpop.f32.mrf.mxu3 }
 0x288   :  { %v2324_v20 = vadd.f32 %v3747_v19, %v2323_v17 }
 0x28f   :  { %v2325_v55 = vpop.f32.mrf.mxu3 }
 0x290   :  { %v2326_v21 = vadd.f32 %v3747_v19, %v2325_v55 }
 0x291   :  { %v2337_v18 = vpop.f32.mrf.mxu1 }
 0x292   :  { %v2338_v23 = vadd.f32 %v2337_v18, %v2324_v20 }
 0x299   :  { %v2339_v22 = vpop.f32.mrf.mxu1 }
 0x29a   :  { %v2340_v24 = vadd.f32 %v2339_v22, %v2326_v21 }
 0x29c   :  { %v3739_v25 = vpack.c.bf16 %v2340_v24, %v2338_v23 }
 0x29e   :  { %3740 = vst [vmem:[%s4020_s7] sm:$0xff] %v3739_v25  }
 0x29f   :  { %2350 = vsyncpa [#allocation3], 1 }
 0x2a0   :  { %2351 = vsyncpa [#allocation5], 1 }

</bundles_post_ra>
